<compile_context>
chip_gen: v6e
topology: v6e:2x2x1
jax: 0.10.0
libtpu: 0.0.40
codegen_flags: <defaults>
</compile_context>

<pallas_src>
import functools

import jax
import jax.numpy as jnp
from jax.experimental import pallas as pl
from jax.experimental.pallas import tpu as pltpu

EPS = 1e-5  # PyTorch LayerNorm default eps


def _layernorm(x, gamma, beta):
    # gamma/beta (1, E) broadcast over (M, E); biased variance (PyTorch), f32 math.
    mu = jnp.mean(x, axis=-1, keepdims=True)
    var = jnp.mean((x - mu) ** 2, axis=-1, keepdims=True)
    return (x - mu) * jax.lax.rsqrt(var + EPS) * gamma + beta


def encoder_stack_kernel(n_head,
                         x_ref, wqkv_ref, bqkv_ref, wo_ref, bo_ref,
                         ln1g_ref, ln1b_ref, w1_ref, b1_ref, w2_ref, b2_ref,
                         ln2g_ref, ln2b_ref, out_ref, x_state):
    """grid = (batch_tiles, n_layer). One grid step = one encoder layer applied to one
    batch tile. The activation tile lives in VMEM scratch across the layer axis."""
    l = pl.program_id(1)
    BB, T, E = x_ref.shape
    M = BB * T
    H = n_head
    Dh = E // H

    @pl.when(l == 0)
    def _():
        x_state[...] = x_ref[...].reshape(M, E)

    x = x_state[...]                                   # (M, E) f32
    xb = x.astype(jnp.bfloat16)

    # --- qkv projection: (M, E) @ (E, 3E), weights pre-transposed to (in, out) ---
    qkv = jnp.dot(xb, wqkv_ref[0], preferred_element_type=jnp.float32) + bqkv_ref[0]

    scale = 1.0 / (Dh ** 0.5)
    q = qkv[:, 0:E] * scale                            # fold 1/sqrt(Dh) into q once
    k = qkv[:, E:2 * E]
    v = qkv[:, 2 * E:3 * E]

    # --- fused-head attention: single batched matmul over G = H * BB groups ---
    def split_heads(t):                                # (M, E) -> (H*BB, T, Dh) bf16
        parts = [t[:, h * Dh:(h + 1) * Dh].reshape(BB, T, Dh) for h in range(H)]
        return jnp.stack(parts, axis=0).reshape(H * BB, T, Dh).astype(jnp.bfloat16)

    qh, kh, vh = split_heads(q), split_heads(k), split_heads(v)
    s = jnp.einsum('gtd,gsd->gts', qh, kh, preferred_element_type=jnp.float32)
    s = s - jnp.max(s, axis=-1, keepdims=True)
    p = jnp.exp(s)
    p = p * pl.reciprocal(jnp.sum(p, axis=-1, keepdims=True), approx=True)
    o = jnp.einsum('gts,gsd->gtd', p.astype(jnp.bfloat16), vh,
                   preferred_element_type=jnp.float32)       # (G, T, Dh) f32
    o = o.reshape(H, BB, T, Dh)
    attn = jnp.concatenate([o[h].reshape(M, Dh) for h in range(H)], axis=-1)  # (M, E)

    attn = jnp.dot(attn.astype(jnp.bfloat16), wo_ref[0],
                   preferred_element_type=jnp.float32) + bo_ref[0]

    # post-LN residual 1
    x = _layernorm(x + attn, ln1g_ref[0], ln1b_ref[0])

    # --- feed forward: linear2(relu(linear1(x))) ---
    h1 = jnp.dot(x.astype(jnp.bfloat16), w1_ref[0],
                 preferred_element_type=jnp.float32) + b1_ref[0]
    h1 = jnp.maximum(h1, 0.0)
    ff = jnp.dot(h1.astype(jnp.bfloat16), w2_ref[0],
                 preferred_element_type=jnp.float32) + b2_ref[0]

    # post-LN residual 2
    x = _layernorm(x + ff, ln2g_ref[0], ln2b_ref[0])
    x_state[...] = x

    @pl.when(l == pl.num_programs(1) - 1)
    def _():
        out_ref[...] = x.reshape(BB, T, E)


def ln_head_kernel(x_ref, g_ref, b_ref, wh_ref, bh_ref, out_ref):
    """Final LayerNorm + Linear(n_embd -> vocab) on a (TM tokens, TV vocab) tile."""
    x = _layernorm(x_ref[...], g_ref[...], b_ref[...])        # (TM, E) f32
    out_ref[...] = jnp.dot(x.astype(jnp.bfloat16), wh_ref[...],
                           preferred_element_type=jnp.float32) + bh_ref[...]


def run_encoder_stack(x, params, n_head, *, target_m=256):
    B, T, E = x.shape
    L = params['w_qkv'].shape[0]
    # batch tile chosen so the flattened matmul M-dim is ~target_m (MXU-friendly),
    # while keeping full T per batch element (attention needs the whole sequence).
    BB = min(B, max(1, target_m // T))
    nb = pl.cdiv(B, BB)

    def wspec(arr):
        return pl.BlockSpec((1,) + arr.shape[1:], lambda b, l: (l, 0, 0))

    weights = (params['w_qkv'], params['b_qkv'], params['w_o'], params['b_o'],
               params['ln1_g'], params['ln1_b'], params['w1'], params['b1'],
               params['w2'], params['b2'], params['ln2_g'], params['ln2_b'])
    in_specs = ([pl.BlockSpec((BB, T, E), lambda b, l: (b, 0, 0))]
                + [wspec(w) for w in weights])

    return pl.pallas_call(
        functools.partial(encoder_stack_kernel, n_head),
        out_shape=jax.ShapeDtypeStruct((B, T, E), jnp.float32),
        grid=(nb, L),
        in_specs=in_specs,
        out_specs=pl.BlockSpec((BB, T, E), lambda b, l: (b, 0, 0)),
        scratch_shapes=[pltpu.VMEM((BB * T, E), jnp.float32)],
        compiler_params=pltpu.CompilerParams(
            dimension_semantics=("parallel", "arbitrary"),
            vmem_limit_bytes=32 * 1024 * 1024),
    )(x, *weights)


def run_ln_head(x2d, params, *, tile_m=256, tile_v=1024):
    M, E = x2d.shape
    V = params['w_head'].shape[1]
    TM = M if M <= tile_m else tile_m
    TV = V if V <= tile_v else tile_v
    grid = (pl.cdiv(M, TM), pl.cdiv(V, TV))
    return pl.pallas_call(
        ln_head_kernel,
        out_shape=jax.ShapeDtypeStruct((M, V), jnp.float32),
        grid=grid,
        in_specs=[
            pl.BlockSpec((TM, E), lambda i, j: (i, 0)),
            pl.BlockSpec((1, E), lambda i, j: (0, 0)),
            pl.BlockSpec((1, E), lambda i, j: (0, 0)),
            pl.BlockSpec((E, TV), lambda i, j: (0, j)),
            pl.BlockSpec((1, TV), lambda i, j: (0, j)),
        ],
        out_specs=pl.BlockSpec((TM, TV), lambda i, j: (i, j)),
        compiler_params=pltpu.CompilerParams(
            dimension_semantics=("parallel", "parallel"),
            vmem_limit_bytes=32 * 1024 * 1024),
    )(x2d, params['lnf_g'], params['lnf_b'], params['w_head'], params['b_head'])


def init_params(key, config):
    V, E = config['vocab_size'], config['n_embd']
    P, L = config['n_positions'], config['n_layer']
    F = 4 * E
    ks = jax.random.split(key, 6)
    # Weights are stored stacked over layers (leading L axis), pre-transposed to
    # (in, out) layout, and cast to bf16 for the MXU; biases / LN params stay f32.
    return {
        'wte': jax.random.normal(ks[0], (V, E), jnp.float32),      # nn.Embedding N(0,1)
        'wpe': jnp.zeros((1, P, E), jnp.float32),                  # nn.Parameter(zeros)
        'lnf_g': jnp.ones((1, E), jnp.float32),
        'lnf_b': jnp.zeros((1, E), jnp.float32),
        'w_head': (jax.random.normal(ks[1], (E, V), jnp.float32) * 0.02).astype(jnp.bfloat16),
        'b_head': jnp.zeros((1, V), jnp.float32),
        'w_qkv': (jax.random.normal(ks[2], (L, E, 3 * E), jnp.float32) * 0.02).astype(jnp.bfloat16),
        'b_qkv': jnp.zeros((L, 1, 3 * E), jnp.float32),
        'w_o':   (jax.random.normal(ks[3], (L, E, E), jnp.float32) * 0.02).astype(jnp.bfloat16),
        'b_o':   jnp.zeros((L, 1, E), jnp.float32),
        'ln1_g': jnp.ones((L, 1, E), jnp.float32),
        'ln1_b': jnp.zeros((L, 1, E), jnp.float32),
        'w1':    (jax.random.normal(ks[4], (L, E, F), jnp.float32) * 0.02).astype(jnp.bfloat16),
        'b1':    jnp.zeros((L, 1, F), jnp.float32),
        'w2':    (jax.random.normal(ks[5], (L, F, E), jnp.float32) * 0.02).astype(jnp.bfloat16),
        'b2':    jnp.zeros((L, 1, E), jnp.float32),
        'ln2_g': jnp.ones((L, 1, E), jnp.float32),
        'ln2_b': jnp.zeros((L, 1, E), jnp.float32),
    }


def nexus_gpt_forward(idx, params, config):
    # glue: shape normalization + embedding gather + positional add in plain JAX
    if idx.ndim == 1:
        idx = idx[None, :]
    elif idx.ndim > 2:
        idx = jnp.squeeze(idx, axis=0)
    B, T = idx.shape
    tok_emb = jnp.take(params['wte'], idx, axis=0)          # (B, T, E)
    pos_emb = params['wpe'][:, :T, :]                       # (1, T, E)
    x = tok_emb + pos_emb
    x = run_encoder_stack(x, params, config['n_head'])      # (B, T, E)
    logits = run_ln_head(x.reshape(B * T, -1), params)      # (B*T, V)
    return logits.reshape(B, T, params['w_head'].shape[1])


if __name__ == "__main__":
    config = dict(vocab_size=64, n_embd=32, n_head=4, n_layer=2, n_positions=16)
    key = jax.random.PRNGKey(0)
    pkey, ikey = jax.random.split(key)
    params = init_params(pkey, config)

    B, T = 2, 8
    idx = jax.random.randint(ikey, (B, T), 0, config['vocab_size'], dtype=jnp.int32)

    logits = nexus_gpt_forward(idx, params, config)
    jax.block_until_ready(logits)
    assert logits.shape == (B, T, config['vocab_size'])
    assert bool(jnp.all(jnp.isfinite(logits)))
    print("KERNEL_OK")
</pallas_src>

<mosaic_0001>
module attributes {stable_mosaic.version = 11 : i64} {
  func.func @encoder_stack_kernel(%arg0: i32, %arg1: i32, %arg2: memref<2x8x32xf32, #tpu.memory_space<vmem>>, %arg3: memref<1x32x96xbf16, #tpu.memory_space<vmem>>, %arg4: memref<1x1x96xf32, #tpu.memory_space<vmem>>, %arg5: memref<1x32x32xbf16, #tpu.memory_space<vmem>>, %arg6: memref<1x1x32xf32, #tpu.memory_space<vmem>>, %arg7: memref<1x1x32xf32, #tpu.memory_space<vmem>>, %arg8: memref<1x1x32xf32, #tpu.memory_space<vmem>>, %arg9: memref<1x32x128xbf16, #tpu.memory_space<vmem>>, %arg10: memref<1x1x128xf32, #tpu.memory_space<vmem>>, %arg11: memref<1x128x32xbf16, #tpu.memory_space<vmem>>, %arg12: memref<1x1x32xf32, #tpu.memory_space<vmem>>, %arg13: memref<1x1x32xf32, #tpu.memory_space<vmem>>, %arg14: memref<1x1x32xf32, #tpu.memory_space<vmem>>, %arg15: memref<2x8x32xf32, #tpu.memory_space<vmem>>, %arg16: memref<16x32xf32, #tpu.memory_space<vmem>>) attributes {dimension_semantics = [#tpu.dimension_semantics<parallel>, #tpu.dimension_semantics<arbitrary>], iteration_bounds = array<i64: 1, 2>, scalar_prefetch = 0 : i64, scratch_operands = 1 : i64, tpu.core_type = #tpu.core_type<tc>, window_params = [{transform_indices = @transform_0, window_bounds = array<i64: 2, 8, 32>}, {transform_indices = @transform_1, window_bounds = array<i64: 1, 32, 96>}, {transform_indices = @transform_2, window_bounds = array<i64: 1, 1, 96>}, {transform_indices = @transform_3, window_bounds = array<i64: 1, 32, 32>}, {transform_indices = @transform_4, window_bounds = array<i64: 1, 1, 32>}, {transform_indices = @transform_5, window_bounds = array<i64: 1, 1, 32>}, {transform_indices = @transform_6, window_bounds = array<i64: 1, 1, 32>}, {transform_indices = @transform_7, window_bounds = array<i64: 1, 32, 128>}, {transform_indices = @transform_8, window_bounds = array<i64: 1, 1, 128>}, {transform_indices = @transform_9, window_bounds = array<i64: 1, 128, 32>}, {transform_indices = @transform_10, window_bounds = array<i64: 1, 1, 32>}, {transform_indices = @transform_11, window_bounds = array<i64: 1, 1, 32>}, {transform_indices = @transform_12, window_bounds = array<i64: 1, 1, 32>}, {transform_indices = @transform_13, window_bounds = array<i64: 2, 8, 32>}]} {
    %c0_i32 = arith.constant 0 : i32
    %0 = arith.cmpi eq, %arg1, %c0_i32 : i32
    %1 = arith.extui %0 : i1 to i32
    %c0_i32_0 = arith.constant 0 : i32
    %2 = arith.cmpi ne, %1, %c0_i32_0 : i32
    scf.if %2 {
      %c0_60 = arith.constant 0 : index
      %c0_61 = arith.constant 0 : index
      %c0_62 = arith.constant 0 : index
      %173 = vector.load %arg2[%c0_60, %c0_61, %c0_62] : memref<2x8x32xf32, #tpu.memory_space<vmem>>, vector<2x8x32xf32>
      %174 = vector.shape_cast %173 : vector<2x8x32xf32> to vector<16x32xf32>
      %c0_63 = arith.constant 0 : index
      %c0_64 = arith.constant 0 : index
      %175 = vector.load %arg16[%c0_63, %c0_64] : memref<16x32xf32, #tpu.memory_space<vmem>>, vector<16x32xf32>
      tpu.vector_store %arg16[%c0_63, %c0_64], %174 {strides = array<i32>} : memref<16x32xf32, #tpu.memory_space<vmem>>, vector<16x32xf32>,
    } else {
    }
    %c0 = arith.constant 0 : index
    %c0_1 = arith.constant 0 : index
    %3 = vector.load %arg16[%c0, %c0_1] : memref<16x32xf32, #tpu.memory_space<vmem>>, vector<16x32xf32>
    %4 = arith.truncf %3 : vector<16x32xf32> to vector<16x32xbf16>
    %c0_2 = arith.constant 0 : index
    %c0_3 = arith.constant 0 : index
    %c0_4 = arith.constant 0 : index
    %5 = vector.load %arg3[%c0_2, %c0_3, %c0_4] : memref<1x32x96xbf16, #tpu.memory_space<vmem>>, vector<1x32x96xbf16>
    %6 = vector.shape_cast %5 : vector<1x32x96xbf16> to vector<32x96xbf16>
    %cst = arith.constant dense<0.000000e+00> : vector<16x96xf32>
    %7 = tpu.matmul %4, %6, %cst {dimension_numbers = #tpu.dot_dimension_numbers<[1], [0], [0], [1], [0, 0, 1, 1], [], []>} : vector<16x32xbf16>, vector<32x96xbf16>, vector<16x96xf32> -> vector<16x96xf32>
    %c0_5 = arith.constant 0 : index
    %c0_6 = arith.constant 0 : index
    %c0_7 = arith.constant 0 : index
    %8 = vector.load %arg4[%c0_5, %c0_6, %c0_7] : memref<1x1x96xf32, #tpu.memory_space<vmem>>, vector<1x1x96xf32>
    %9 = vector.shape_cast %8 : vector<1x1x96xf32> to vector<1x96xf32>
    %10 = vector.broadcast %9 : vector<1x96xf32> to vector<16x96xf32>
    %11 = arith.addf %7, %10 : vector<16x96xf32>
    %12 = vector.extract_strided_slice %11 {offsets = [0, 0], sizes = [16, 32], strides = [1, 1]} : vector<16x96xf32> to vector<16x32xf32>
    %cst_8 = arith.constant 0.353553385 : f32
    %13 = vector.broadcast %cst_8 : f32 to vector<16x32xf32>
    %14 = arith.mulf %12, %13 : vector<16x32xf32>
    %15 = vector.extract_strided_slice %11 {offsets = [0, 32], sizes = [16, 32], strides = [1, 1]} : vector<16x96xf32> to vector<16x32xf32>
    %16 = vector.extract_strided_slice %11 {offsets = [0, 64], sizes = [16, 32], strides = [1, 1]} : vector<16x96xf32> to vector<16x32xf32>
    %17 = vector.extract_strided_slice %14 {offsets = [0, 0], sizes = [16, 8], strides = [1, 1]} : vector<16x32xf32> to vector<16x8xf32>
    %18 = vector.shape_cast %17 : vector<16x8xf32> to vector<2x8x8xf32>
    %19 = vector.extract_strided_slice %14 {offsets = [0, 8], sizes = [16, 8], strides = [1, 1]} : vector<16x32xf32> to vector<16x8xf32>
    %20 = vector.shape_cast %19 : vector<16x8xf32> to vector<2x8x8xf32>
    %21 = vector.extract_strided_slice %14 {offsets = [0, 16], sizes = [16, 8], strides = [1, 1]} : vector<16x32xf32> to vector<16x8xf32>
    %22 = vector.shape_cast %21 : vector<16x8xf32> to vector<2x8x8xf32>
    %23 = vector.extract_strided_slice %14 {offsets = [0, 24], sizes = [16, 8], strides = [1, 1]} : vector<16x32xf32> to vector<16x8xf32>
    %24 = vector.shape_cast %23 : vector<16x8xf32> to vector<2x8x8xf32>
    %25 = vector.shape_cast %18 : vector<2x8x8xf32> to vector<1x2x8x8xf32>
    %26 = vector.shape_cast %20 : vector<2x8x8xf32> to vector<1x2x8x8xf32>
    %27 = vector.shape_cast %22 : vector<2x8x8xf32> to vector<1x2x8x8xf32>
    %28 = vector.shape_cast %24 : vector<2x8x8xf32> to vector<1x2x8x8xf32>
    %29 = tpu.concatenate %25, %26, %27, %28 in 0 : vector<1x2x8x8xf32>, vector<1x2x8x8xf32>, vector<1x2x8x8xf32>, vector<1x2x8x8xf32> -> vector<4x2x8x8xf32>
    %30 = vector.shape_cast %29 : vector<4x2x8x8xf32> to vector<8x8x8xf32>
    %31 = arith.truncf %30 : vector<8x8x8xf32> to vector<8x8x8xbf16>
    %32 = vector.extract_strided_slice %15 {offsets = [0, 0], sizes = [16, 8], strides = [1, 1]} : vector<16x32xf32> to vector<16x8xf32>
    %33 = vector.shape_cast %32 : vector<16x8xf32> to vector<2x8x8xf32>
    %34 = vector.extract_strided_slice %15 {offsets = [0, 8], sizes = [16, 8], strides = [1, 1]} : vector<16x32xf32> to vector<16x8xf32>
    %35 = vector.shape_cast %34 : vector<16x8xf32> to vector<2x8x8xf32>
    %36 = vector.extract_strided_slice %15 {offsets = [0, 16], sizes = [16, 8], strides = [1, 1]} : vector<16x32xf32> to vector<16x8xf32>
    %37 = vector.shape_cast %36 : vector<16x8xf32> to vector<2x8x8xf32>
    %38 = vector.extract_strided_slice %15 {offsets = [0, 24], sizes = [16, 8], strides = [1, 1]} : vector<16x32xf32> to vector<16x8xf32>
    %39 = vector.shape_cast %38 : vector<16x8xf32> to vector<2x8x8xf32>
    %40 = vector.shape_cast %33 : vector<2x8x8xf32> to vector<1x2x8x8xf32>
    %41 = vector.shape_cast %35 : vector<2x8x8xf32> to vector<1x2x8x8xf32>
    %42 = vector.shape_cast %37 : vector<2x8x8xf32> to vector<1x2x8x8xf32>
    %43 = vector.shape_cast %39 : vector<2x8x8xf32> to vector<1x2x8x8xf32>
    %44 = tpu.concatenate %40, %41, %42, %43 in 0 : vector<1x2x8x8xf32>, vector<1x2x8x8xf32>, vector<1x2x8x8xf32>, vector<1x2x8x8xf32> -> vector<4x2x8x8xf32>
    %45 = vector.shape_cast %44 : vector<4x2x8x8xf32> to vector<8x8x8xf32>
    %46 = arith.truncf %45 : vector<8x8x8xf32> to vector<8x8x8xbf16>
    %47 = vector.extract_strided_slice %16 {offsets = [0, 0], sizes = [16, 8], strides = [1, 1]} : vector<16x32xf32> to vector<16x8xf32>
    %48 = vector.shape_cast %47 : vector<16x8xf32> to vector<2x8x8xf32>
    %49 = vector.extract_strided_slice %16 {offsets = [0, 8], sizes = [16, 8], strides = [1, 1]} : vector<16x32xf32> to vector<16x8xf32>
    %50 = vector.shape_cast %49 : vector<16x8xf32> to vector<2x8x8xf32>
    %51 = vector.extract_strided_slice %16 {offsets = [0, 16], sizes = [16, 8], strides = [1, 1]} : vector<16x32xf32> to vector<16x8xf32>
    %52 = vector.shape_cast %51 : vector<16x8xf32> to vector<2x8x8xf32>
    %53 = vector.extract_strided_slice %16 {offsets = [0, 24], sizes = [16, 8], strides = [1, 1]} : vector<16x32xf32> to vector<16x8xf32>
    %54 = vector.shape_cast %53 : vector<16x8xf32> to vector<2x8x8xf32>
    %55 = vector.shape_cast %48 : vector<2x8x8xf32> to vector<1x2x8x8xf32>
    %56 = vector.shape_cast %50 : vector<2x8x8xf32> to vector<1x2x8x8xf32>
    %57 = vector.shape_cast %52 : vector<2x8x8xf32> to vector<1x2x8x8xf32>
    %58 = vector.shape_cast %54 : vector<2x8x8xf32> to vector<1x2x8x8xf32>
    %59 = tpu.concatenate %55, %56, %57, %58 in 0 : vector<1x2x8x8xf32>, vector<1x2x8x8xf32>, vector<1x2x8x8xf32>, vector<1x2x8x8xf32> -> vector<4x2x8x8xf32>
    %60 = vector.shape_cast %59 : vector<4x2x8x8xf32> to vector<8x8x8xf32>
    %61 = arith.truncf %60 : vector<8x8x8xf32> to vector<8x8x8xbf16>
    "tpu.trace_start"() <{level = 10 : i32, message = "gtd,gsd->gts"}> : () -> ()
    %cst_9 = arith.constant dense<0.000000e+00> : vector<8x8x8xf32>
    %62 = tpu.matmul %31, %46, %cst_9 {dimension_numbers = #tpu.dot_dimension_numbers<[2], [2], [1], [1], [0, 0, 0, 1, 1, 1], [0], [0]>} : vector<8x8x8xbf16>, vector<8x8x8xbf16>, vector<8x8x8xf32> -> vector<8x8x8xf32>
    "tpu.trace_stop"() : () -> ()
    %cst_10 = arith.constant dense<0xFF800000> : vector<8x8xf32>
    %63 = vector.multi_reduction <maximumf>, %62, %cst_10 [2] : vector<8x8x8xf32> to vector<8x8xf32>
    %64 = vector.shape_cast %63 : vector<8x8xf32> to vector<8x8x1xf32>
    %65 = vector.broadcast %64 : vector<8x8x1xf32> to vector<8x8x8xf32>
    %66 = arith.subf %62, %65 : vector<8x8x8xf32>
    %67 = math.exp %66 : vector<8x8x8xf32>
    %cst_11 = arith.constant dense<0.000000e+00> : vector<8x8xf32>
    %68 = vector.multi_reduction <add>, %67, %cst_11 [2] : vector<8x8x8xf32> to vector<8x8xf32>
    %69 = vector.shape_cast %68 : vector<8x8xf32> to vector<8x8x1xf32>
    %70 = tpu.reciprocal %69 {approx = true} : vector<8x8x1xf32> -> vector<8x8x1xf32>
    %71 = vector.broadcast %70 : vector<8x8x1xf32> to vector<8x8x8xf32>
    %72 = arith.mulf %67, %71 : vector<8x8x8xf32>
    %73 = arith.truncf %72 : vector<8x8x8xf32> to vector<8x8x8xbf16>
    "tpu.trace_start"() <{level = 10 : i32, message = "gts,gsd->gtd"}> : () -> ()
    %cst_12 = arith.constant dense<0.000000e+00> : vector<8x8x8xf32>
    %74 = tpu.matmul %73, %61, %cst_12 {dimension_numbers = #tpu.dot_dimension_numbers<[2], [1], [1], [2], [0, 0, 0, 1, 1, 2], [0], [0]>} : vector<8x8x8xbf16>, vector<8x8x8xbf16>, vector<8x8x8xf32> -> vector<8x8x8xf32>
    "tpu.trace_stop"() : () -> ()
    %75 = vector.shape_cast %74 : vector<8x8x8xf32> to vector<4x2x8x8xf32>
    %76 = vector.extract_strided_slice %75 {offsets = [0, 0, 0, 0], sizes = [1, 2, 8, 8], strides = [1, 1, 1, 1]} : vector<4x2x8x8xf32> to vector<1x2x8x8xf32>
    %77 = vector.shape_cast %76 : vector<1x2x8x8xf32> to vector<2x8x8xf32>
    %78 = vector.shape_cast %77 : vector<2x8x8xf32> to vector<16x8xf32>
    %79 = vector.extract_strided_slice %75 {offsets = [1, 0, 0, 0], sizes = [1, 2, 8, 8], strides = [1, 1, 1, 1]} : vector<4x2x8x8xf32> to vector<1x2x8x8xf32>
    %80 = vector.shape_cast %79 : vector<1x2x8x8xf32> to vector<2x8x8xf32>
    %81 = vector.shape_cast %80 : vector<2x8x8xf32> to vector<16x8xf32>
    %82 = vector.extract_strided_slice %75 {offsets = [2, 0, 0, 0], sizes = [1, 2, 8, 8], strides = [1, 1, 1, 1]} : vector<4x2x8x8xf32> to vector<1x2x8x8xf32>
    %83 = vector.shape_cast %82 : vector<1x2x8x8xf32> to vector<2x8x8xf32>
    %84 = vector.shape_cast %83 : vector<2x8x8xf32> to vector<16x8xf32>
    %85 = vector.extract_strided_slice %75 {offsets = [3, 0, 0, 0], sizes = [1, 2, 8, 8], strides = [1, 1, 1, 1]} : vector<4x2x8x8xf32> to vector<1x2x8x8xf32>
    %86 = vector.shape_cast %85 : vector<1x2x8x8xf32> to vector<2x8x8xf32>
    %87 = vector.shape_cast %86 : vector<2x8x8xf32> to vector<16x8xf32>
    %88 = tpu.concatenate %78, %81, %84, %87 in 1 : vector<16x8xf32>, vector<16x8xf32>, vector<16x8xf32>, vector<16x8xf32> -> vector<16x32xf32>
    %89 = arith.truncf %88 : vector<16x32xf32> to vector<16x32xbf16>
    %c0_13 = arith.constant 0 : index
    %c0_14 = arith.constant 0 : index
    %c0_15 = arith.constant 0 : index
    %90 = vector.load %arg5[%c0_13, %c0_14, %c0_15] : memref<1x32x32xbf16, #tpu.memory_space<vmem>>, vector<1x32x32xbf16>
    %91 = vector.shape_cast %90 : vector<1x32x32xbf16> to vector<32x32xbf16>
    %cst_16 = arith.constant dense<0.000000e+00> : vector<16x32xf32>
    %92 = tpu.matmul %89, %91, %cst_16 {dimension_numbers = #tpu.dot_dimension_numbers<[1], [0], [0], [1], [0, 0, 1, 1], [], []>} : vector<16x32xbf16>, vector<32x32xbf16>, vector<16x32xf32> -> vector<16x32xf32>
    %c0_17 = arith.constant 0 : index
    %c0_18 = arith.constant 0 : index
    %c0_19 = arith.constant 0 : index
    %93 = vector.load %arg6[%c0_17, %c0_18, %c0_19] : memref<1x1x32xf32, #tpu.memory_space<vmem>>, vector<1x1x32xf32>
    %94 = vector.shape_cast %93 : vector<1x1x32xf32> to vector<1x32xf32>
    %95 = vector.broadcast %94 : vector<1x32xf32> to vector<16x32xf32>
    %96 = arith.addf %92, %95 : vector<16x32xf32>
    %97 = arith.addf %3, %96 : vector<16x32xf32>
    %c0_20 = arith.constant 0 : index
    %c0_21 = arith.constant 0 : index
    %c0_22 = arith.constant 0 : index
    %98 = vector.load %arg7[%c0_20, %c0_21, %c0_22] : memref<1x1x32xf32, #tpu.memory_space<vmem>>, vector<1x1x32xf32>
    %99 = vector.shape_cast %98 : vector<1x1x32xf32> to vector<1x32xf32>
    %c0_23 = arith.constant 0 : index
    %c0_24 = arith.constant 0 : index
    %c0_25 = arith.constant 0 : index
    %100 = vector.load %arg8[%c0_23, %c0_24, %c0_25] : memref<1x1x32xf32, #tpu.memory_space<vmem>>, vector<1x1x32xf32>
    %101 = vector.shape_cast %100 : vector<1x1x32xf32> to vector<1x32xf32>
    %cst_26 = arith.constant dense<0.000000e+00> : vector<16xf32>
    %102 = vector.multi_reduction <add>, %97, %cst_26 [1] : vector<16x32xf32> to vector<16xf32>
    %103 = vector.shape_cast %102 : vector<16xf32> to vector<16x1xf32>
    %cst_27 = arith.constant 3.200000e+01 : f32
    %104 = vector.broadcast %cst_27 : f32 to vector<16x1xf32>
    %105 = arith.divf %103, %104 : vector<16x1xf32>
    %106 = vector.broadcast %105 : vector<16x1xf32> to vector<16x32xf32>
    %107 = arith.subf %97, %106 : vector<16x32xf32>
    %108 = arith.mulf %107, %107 : vector<16x32xf32>
    %cst_28 = arith.constant dense<0.000000e+00> : vector<16xf32>
    %109 = vector.multi_reduction <add>, %108, %cst_28 [1] : vector<16x32xf32> to vector<16xf32>
    %110 = vector.shape_cast %109 : vector<16xf32> to vector<16x1xf32>
    %cst_29 = arith.constant 3.200000e+01 : f32
    %111 = vector.broadcast %cst_29 : f32 to vector<16x1xf32>
    %112 = arith.divf %110, %111 : vector<16x1xf32>
    %113 = vector.broadcast %105 : vector<16x1xf32> to vector<16x32xf32>
    %114 = arith.subf %97, %113 : vector<16x32xf32>
    %cst_30 = arith.constant 9.99999974E-6 : f32
    %115 = vector.broadcast %cst_30 : f32 to vector<16x1xf32>
    %116 = arith.addf %112, %115 : vector<16x1xf32>
    %117 = math.rsqrt %116 : vector<16x1xf32>
    %118 = vector.broadcast %117 : vector<16x1xf32> to vector<16x32xf32>
    %119 = arith.mulf %114, %118 : vector<16x32xf32>
    %120 = vector.broadcast %99 : vector<1x32xf32> to vector<16x32xf32>
    %121 = arith.mulf %119, %120 : vector<16x32xf32>
    %122 = vector.broadcast %101 : vector<1x32xf32> to vector<16x32xf32>
    %123 = arith.addf %121, %122 : vector<16x32xf32>
    %124 = arith.truncf %123 : vector<16x32xf32> to vector<16x32xbf16>
    %c0_31 = arith.constant 0 : index
    %c0_32 = arith.constant 0 : index
    %c0_33 = arith.constant 0 : index
    %125 = vector.load %arg9[%c0_31, %c0_32, %c0_33] : memref<1x32x128xbf16, #tpu.memory_space<vmem>>, vector<1x32x128xbf16>
    %126 = vector.shape_cast %125 : vector<1x32x128xbf16> to vector<32x128xbf16>
    %cst_34 = arith.constant dense<0.000000e+00> : vector<16x128xf32>
    %127 = tpu.matmul %124, %126, %cst_34 {dimension_numbers = #tpu.dot_dimension_numbers<[1], [0], [0], [1], [0, 0, 1, 1], [], []>} : vector<16x32xbf16>, vector<32x128xbf16>, vector<16x128xf32> -> vector<16x128xf32>
    %c0_35 = arith.constant 0 : index
    %c0_36 = arith.constant 0 : index
    %c0_37 = arith.constant 0 : index
    %128 = vector.load %arg10[%c0_35, %c0_36, %c0_37] : memref<1x1x128xf32, #tpu.memory_space<vmem>>, vector<1x1x128xf32>
    %129 = vector.shape_cast %128 : vector<1x1x128xf32> to vector<1x128xf32>
    %130 = vector.broadcast %129 : vector<1x128xf32> to vector<16x128xf32>
    %131 = arith.addf %127, %130 : vector<16x128xf32>
    %cst_38 = arith.constant 0.000000e+00 : f32
    %132 = vector.broadcast %cst_38 : f32 to vector<16x128xf32>
    %133 = arith.maximumf %131, %132 : vector<16x128xf32>
    %134 = arith.truncf %133 : vector<16x128xf32> to vector<16x128xbf16>
    %c0_39 = arith.constant 0 : index
    %c0_40 = arith.constant 0 : index
    %c0_41 = arith.constant 0 : index
    %135 = vector.load %arg11[%c0_39, %c0_40, %c0_41] : memref<1x128x32xbf16, #tpu.memory_space<vmem>>, vector<1x128x32xbf16>
    %136 = vector.shape_cast %135 : vector<1x128x32xbf16> to vector<128x32xbf16>
    %cst_42 = arith.constant dense<0.000000e+00> : vector<16x32xf32>
    %137 = tpu.matmul %134, %136, %cst_42 {dimension_numbers = #tpu.dot_dimension_numbers<[1], [0], [0], [1], [0, 0, 1, 1], [], []>} : vector<16x128xbf16>, vector<128x32xbf16>, vector<16x32xf32> -> vector<16x32xf32>
    %c0_43 = arith.constant 0 : index
    %c0_44 = arith.constant 0 : index
    %c0_45 = arith.constant 0 : index
    %138 = vector.load %arg12[%c0_43, %c0_44, %c0_45] : memref<1x1x32xf32, #tpu.memory_space<vmem>>, vector<1x1x32xf32>
    %139 = vector.shape_cast %138 : vector<1x1x32xf32> to vector<1x32xf32>
    %140 = vector.broadcast %139 : vector<1x32xf32> to vector<16x32xf32>
    %141 = arith.addf %137, %140 : vector<16x32xf32>
    %142 = arith.addf %123, %141 : vector<16x32xf32>
    %c0_46 = arith.constant 0 : index
    %c0_47 = arith.constant 0 : index
    %c0_48 = arith.constant 0 : index
    %143 = vector.load %arg13[%c0_46, %c0_47, %c0_48] : memref<1x1x32xf32, #tpu.memory_space<vmem>>, vector<1x1x32xf32>
    %144 = vector.shape_cast %143 : vector<1x1x32xf32> to vector<1x32xf32>
    %c0_49 = arith.constant 0 : index
    %c0_50 = arith.constant 0 : index
    %c0_51 = arith.constant 0 : index
    %145 = vector.load %arg14[%c0_49, %c0_50, %c0_51] : memref<1x1x32xf32, #tpu.memory_space<vmem>>, vector<1x1x32xf32>
    %146 = vector.shape_cast %145 : vector<1x1x32xf32> to vector<1x32xf32>
    %cst_52 = arith.constant dense<0.000000e+00> : vector<16xf32>
    %147 = vector.multi_reduction <add>, %142, %cst_52 [1] : vector<16x32xf32> to vector<16xf32>
    %148 = vector.shape_cast %147 : vector<16xf32> to vector<16x1xf32>
    %cst_53 = arith.constant 3.200000e+01 : f32
    %149 = vector.broadcast %cst_53 : f32 to vector<16x1xf32>
    %150 = arith.divf %148, %149 : vector<16x1xf32>
    %151 = vector.broadcast %150 : vector<16x1xf32> to vector<16x32xf32>
    %152 = arith.subf %142, %151 : vector<16x32xf32>
    %153 = arith.mulf %152, %152 : vector<16x32xf32>
    %cst_54 = arith.constant dense<0.000000e+00> : vector<16xf32>
    %154 = vector.multi_reduction <add>, %153, %cst_54 [1] : vector<16x32xf32> to vector<16xf32>
    %155 = vector.shape_cast %154 : vector<16xf32> to vector<16x1xf32>
    %cst_55 = arith.constant 3.200000e+01 : f32
    %156 = vector.broadcast %cst_55 : f32 to vector<16x1xf32>
    %157 = arith.divf %155, %156 : vector<16x1xf32>
    %158 = vector.broadcast %150 : vector<16x1xf32> to vector<16x32xf32>
    %159 = arith.subf %142, %158 : vector<16x32xf32>
    %cst_56 = arith.constant 9.99999974E-6 : f32
    %160 = vector.broadcast %cst_56 : f32 to vector<16x1xf32>
    %161 = arith.addf %157, %160 : vector<16x1xf32>
    %162 = math.rsqrt %161 : vector<16x1xf32>
    %163 = vector.broadcast %162 : vector<16x1xf32> to vector<16x32xf32>
    %164 = arith.mulf %159, %163 : vector<16x32xf32>
    %165 = vector.broadcast %144 : vector<1x32xf32> to vector<16x32xf32>
    %166 = arith.mulf %164, %165 : vector<16x32xf32>
    %167 = vector.broadcast %146 : vector<1x32xf32> to vector<16x32xf32>
    %168 = arith.addf %166, %167 : vector<16x32xf32>
    %c0_57 = arith.constant 0 : index
    %c0_58 = arith.constant 0 : index
    %169 = vector.load %arg16[%c0_57, %c0_58] : memref<16x32xf32, #tpu.memory_space<vmem>>, vector<16x32xf32>
    tpu.vector_store %arg16[%c0_57, %c0_58], %168 {strides = array<i32>} : memref<16x32xf32, #tpu.memory_space<vmem>>, vector<16x32xf32>,
    %c1_i32 = arith.constant 1 : i32
    %170 = arith.cmpi eq, %arg1, %c1_i32 : i32
    %171 = arith.extui %170 : i1 to i32
    %c0_i32_59 = arith.constant 0 : i32
    %172 = arith.cmpi ne, %171, %c0_i32_59 : i32
    scf.if %172 {
      %173 = vector.shape_cast %168 : vector<16x32xf32> to vector<2x8x32xf32>
      %c0_60 = arith.constant 0 : index
      %c0_61 = arith.constant 0 : index
      %c0_62 = arith.constant 0 : index
      %174 = vector.load %arg15[%c0_60, %c0_61, %c0_62] : memref<2x8x32xf32, #tpu.memory_space<vmem>>, vector<2x8x32xf32>
      tpu.vector_store %arg15[%c0_60, %c0_61, %c0_62], %173 {strides = array<i32>} : memref<2x8x32xf32, #tpu.memory_space<vmem>>, vector<2x8x32xf32>,
    } else {
    }
    return
  }
  func.func @transform_0(%arg0: i32, %arg1: i32) -> (i32, i32, i32) {
    %c0_i32 = arith.constant 0 : i32
    %c0_i32_0 = arith.constant 0 : i32
    %c0_i32_1 = arith.constant 0 : i32
    return %arg0, %c0_i32, %c0_i32_0 : i32, i32, i32
  }
  func.func @transform_1(%arg0: i32, %arg1: i32) -> (i32, i32, i32) {
    %c0_i32 = arith.constant 0 : i32
    %c0_i32_0 = arith.constant 0 : i32
    %c0_i32_1 = arith.constant 0 : i32
    return %arg1, %c0_i32, %c0_i32_0 : i32, i32, i32
  }
  func.func @transform_2(%arg0: i32, %arg1: i32) -> (i32, i32, i32) {
    %c0_i32 = arith.constant 0 : i32
    %c0_i32_0 = arith.constant 0 : i32
    %c0_i32_1 = arith.constant 0 : i32
    return %arg1, %c0_i32, %c0_i32_0 : i32, i32, i32
  }
  func.func @transform_3(%arg0: i32, %arg1: i32) -> (i32, i32, i32) {
    %c0_i32 = arith.constant 0 : i32
    %c0_i32_0 = arith.constant 0 : i32
    %c0_i32_1 = arith.constant 0 : i32
    return %arg1, %c0_i32, %c0_i32_0 : i32, i32, i32
  }
  func.func @transform_4(%arg0: i32, %arg1: i32) -> (i32, i32, i32) {
    %c0_i32 = arith.constant 0 : i32
    %c0_i32_0 = arith.constant 0 : i32
    %c0_i32_1 = arith.constant 0 : i32
    return %arg1, %c0_i32, %c0_i32_0 : i32, i32, i32
  }
  func.func @transform_5(%arg0: i32, %arg1: i32) -> (i32, i32, i32) {
    %c0_i32 = arith.constant 0 : i32
    %c0_i32_0 = arith.constant 0 : i32
    %c0_i32_1 = arith.constant 0 : i32
    return %arg1, %c0_i32, %c0_i32_0 : i32, i32, i32
  }
  func.func @transform_6(%arg0: i32, %arg1: i32) -> (i32, i32, i32) {
    %c0_i32 = arith.constant 0 : i32
    %c0_i32_0 = arith.constant 0 : i32
    %c0_i32_1 = arith.constant 0 : i32
    return %arg1, %c0_i32, %c0_i32_0 : i32, i32, i32
  }
  func.func @transform_7(%arg0: i32, %arg1: i32) -> (i32, i32, i32) {
    %c0_i32 = arith.constant 0 : i32
    %c0_i32_0 = arith.constant 0 : i32
    %c0_i32_1 = arith.constant 0 : i32
    return %arg1, %c0_i32, %c0_i32_0 : i32, i32, i32
  }
  func.func @transform_8(%arg0: i32, %arg1: i32) -> (i32, i32, i32) {
    %c0_i32 = arith.constant 0 : i32
    %c0_i32_0 = arith.constant 0 : i32
    %c0_i32_1 = arith.constant 0 : i32
    return %arg1, %c0_i32, %c0_i32_0 : i32, i32, i32
  }
  func.func @transform_9(%arg0: i32, %arg1: i32) -> (i32, i32, i32) {
    %c0_i32 = arith.constant 0 : i32
    %c0_i32_0 = arith.constant 0 : i32
    %c0_i32_1 = arith.constant 0 : i32
    return %arg1, %c0_i32, %c0_i32_0 : i32, i32, i32
  }
  func.func @transform_10(%arg0: i32, %arg1: i32) -> (i32, i32, i32) {
    %c0_i32 = arith.constant 0 : i32
    %c0_i32_0 = arith.constant 0 : i32
    %c0_i32_1 = arith.constant 0 : i32
    return %arg1, %c0_i32, %c0_i32_0 : i32, i32, i32
  }
  func.func @transform_11(%arg0: i32, %arg1: i32) -> (i32, i32, i32) {
    %c0_i32 = arith.constant 0 : i32
    %c0_i32_0 = arith.constant 0 : i32
    %c0_i32_1 = arith.constant 0 : i32
    return %arg1, %c0_i32, %c0_i32_0 : i32, i32, i32
  }
  func.func @transform_12(%arg0: i32, %arg1: i32) -> (i32, i32, i32) {
    %c0_i32 = arith.constant 0 : i32
    %c0_i32_0 = arith.constant 0 : i32
    %c0_i32_1 = arith.constant 0 : i32
    return %arg1, %c0_i32, %c0_i32_0 : i32, i32, i32
  }
  func.func @transform_13(%arg0: i32, %arg1: i32) -> (i32, i32, i32) {
    %c0_i32 = arith.constant 0 : i32
    %c0_i32_0 = arith.constant 0 : i32
    %c0_i32_1 = arith.constant 0 : i32
    return %arg0, %c0_i32, %c0_i32_0 : i32, i32, i32
  }
}

</mosaic_0001>

<bundles_post_ra>
// kernel: tpu_custom_call.1
= control target key start
LH: loop header
LB: loop body
LE: loop exit
PB: predicated region body
PF: predicated region fallthrough
CT: control target
= control target key end

     0   :  { %s3140_s0 = inlined_call_operand.vmem [shape: f32[2,8,32], index: 0, kind: input, shape index: {}]   ;;  %s3141_s1 = inlined_call_operand.vmem [shape: bf16[2,32,96], index: 1, kind: input, shape index: {}]   ;;  %s3142_s2 = inlined_call_operand.vmem [shape: f32[2,1,96], index: 2, kind: input, shape index: {}]   ;;  %s3143_s3 = inlined_call_operand.vmem [shape: bf16[2,32,32], index: 3, kind: input, shape index: {}]   ;;  %s3144_s4 = inlined_call_operand.vmem [shape: f32[2,1,32], index: 4, kind: input, shape index: {}]   ;;  %s3145_s5 = inlined_call_operand.vmem [shape: f32[2,1,32], index: 5, kind: input, shape index: {}]   ;;  %s3146_s6 = inlined_call_operand.vmem [shape: f32[2,1,32], index: 6, kind: input, shape index: {}]   ;;  %s3147_s7 = inlined_call_operand.vmem [shape: bf16[2,32,128], index: 7, kind: input, shape index: {}]   ;;  %s3148_s8 = inlined_call_operand.vmem [shape: f32[2,1,128], index: 8, kind: input, shape index: {}]   ;;  %s3149_s9 = inlined_call_operand.vmem [shape: bf16[2,128,32], index: 9, kind: input, shape index: {}]   ;;  %s3150_s10 = inlined_call_operand.vmem [shape: f32[2,1,32], index: 10, kind: input, shape index: {}]   ;;  %s3151_s11 = inlined_call_operand.vmem [shape: f32[2,1,32], index: 11, kind: input, shape index: {}]   ;;  %s3152_s12 = inlined_call_operand.vmem [shape: f32[2,1,32], index: 12, kind: input, shape index: {}]   ;;  %s3153_s13 = inlined_call_operand.hbm [shape: f32[2,8,32], index: 13, kind: output, shape index: {}]  }
   0x1   :  { %3157 = sst [smem:[#allocation9_spill]] %s3140_s0 }
   0x2   :  { %3158 = sst [smem:[#allocation10_spill]] %s3141_s1 }
   0x3   :  { %3159 = sst [smem:[#allocation11_spill]] %s3143_s3 }
   0x4   :  { %3160 = sst [smem:[#allocation12_spill]] %s3153_s13 }
   0x5   :  { %18 = vsyncpa [#allocation4], 0  ;;  %s2750_s25 = smov 0   ;;  %s2752_s26 = smov 0  }
   0x6   :  { %s2754_s27 = smov 0  }
   0x7 LB: > { %3161 = sst [smem:[#allocation6_spill]] %s2662_s26  ;;  %s33_s29 = sadd.s32 1, %s2662_s26  ;;  %s2666_s27 = sphi %s2754_s27, %s24_s27   ;;  %s2662_s26 = sphi %s2752_s26, %s3177_s26   ;;  %s2658_s25 = sphi %s2750_s25, %s3176_s25  }
   0x8   : > { %3162 = sst [smem:[#allocation7_spill]] %s2666_s27  ;;  %p34_p0 = scmp.ge.s32.totalorder %s33_s29, 2 }
   0x9   : > { %p2225_p1 = scmp.ge.s32.totalorder %s2666_s27, 1  ;;  %p505_p2 = scmp.lt.s32.totalorder %s2666_s27, 3 }
   0xa   : > { %s3179_s29 = smov (%p34_p0, %s33_s29), 0 }
   0xb   : > { %3163 = sst [smem:[#allocation8_spill]] %s3179_s29  ;;  %p506_p3 = pnand %p2225_p1, %p505_p2 }
   0xc   : > { %p594_p4 = scmp.lt.s32.totalorder (!%p506_p3), %s2658_s25, 1  ;;  %s3164_s1 = sld [smem:[#allocation10_spill]] (!%p506_p3) }
   0xd   : > { %509 = sbr.rel (%p506_p3) target bundleno = 2622 (0xa3e), region = 72  ;;  %s3165_s3 = sld [smem:[#allocation11_spill]] (!%p506_p3) }
   0xe   : > { %p2234_p5 = scmp.ne.s32.totalorder (!%p506_p3), %s2658_s25, 0 }
  0x12   : > { %s2773_s30 = scalar_select %p594_p4, %s2658_s25, 1 }
  0x13   : > { %s3166_s28 = sld [smem:[#allocation9_spill]] (!%p2234_p5) }
  0x14   : > { %s2281_s14 = sshll.u32 %s2773_s30, 4  ;;  %s631_s0 = scalar_lea.vmem %s3150_s10, %s2773_s30 }
  0x15   : > { %s598_s20 = scalar_lea.vmem %s3164_s1, %s2281_s14  ;;  %s2786_s23 = scalar_lea.vmem %s3165_s3, %s2281_s14 }
  0x16   : > { %s2803_s19 = scalar_lea.vmem %s3147_s7, %s2281_s14  ;;  %s623_s1 = scalar_lea.vmem %s3148_s8, %s2773_s30 }
  0x17   : > { %s2284_s3 = sshll.u32 %s2773_s30, 6  ;;  %s634_s17 = scalar_lea.vmem %s3151_s11, %s2773_s30 }
  0x18   : > { %s2813_s29 = scalar_lea.vmem %s3149_s9, %s2284_s3  ;;  %s637_s27 = scalar_lea.vmem %s3152_s12, %s2773_s30 }
  0x19   : > { %643 = sbr.rel (%p2234_p5) target bundleno = 32 (0x20), region = 76 }
  0x1e   : > { %v644_v0 = vld [vmem:[%s3166_s28] sm:$0xff]  ;;  %vm646_vm0 = vcmask 261120   ;;  %v645_v1 = vld [vmem:[%s3166_s28 + $0x8] sm:$0xff] }
  0x1f   : > { %647 = vst.msk [vmem:[#allocation2] sm:$0xff] %vm646_vm0, %v644_v0  ;;  %648 = vst.msk [vmem:[#allocation2 + $0x8] sm:$0xff] %vm646_vm0, %v645_v1 }
  0x20 PF: > { %v2562_v2 = vld [vmem:[%s598_s20 + $0x8] sm:$0xff]   ;;  %v2668_v3 = vmov 0.0   ;;  %v2563_v4 = vld [vmem:[%s598_s20] sm:$0xff]   ;;  %vm2669_vm1 = vmmov 0   ;;  %vm675_vm2 = vcmask 261120   ;;  %s3167_s13 = scalar_lea.vmem %s3142_s2, %s2773_s30  ;;  %s2670_s26 = smov 104  }
  0x21   : > { %2335 = vmatprep.subr.bf16.mxu0 %v2668_v3  ;;  %2355 = vmatprep.subr.bf16.mxu1 %v2668_v3  ;;  %v2235_v9 = vld [vmem:[%s3167_s13] ss:$0 sm:$0xff]  ;;  %s2671_s15 = smov 120   ;;  %s2672_s14 = smov 96   ;;  %vm781_vm3 = vcmask 64512   ;;  %vm1272_vm4 = vcmask 1043456  }
  0x22   : > { %2336 = vmatpush3.bf16.msra.mxu0 %v2562_v2  ;;  %2339 = vmatprep.mubr.msk.bf16.mxu0 %vm2669_vm1, %v2668_v3  ;;  %s2673_s18 = smov 112   ;;  %s2674_s21 = smov 64   ;;  %vm1678_vm5 = vcmask 130048   ;;  %vm1681_vm6 = vcmask 195584  }
  0x23   : > { %2337 = vmatprep.subr.bf16.mxu0 %v2668_v3  ;;  %2357 = vmatprep.mubr.msk.bf16.mxu1 %vm2669_vm1, %v2668_v3  ;;  %s2675_s22 = smov 8   ;;  %s2676_s3 = smov 16  }
  0x24   : > { %s2677_s24 = smov 24   ;;  %s3168_s16 = scalar_lea.vmem %s3144_s4, %s2773_s30 }
  0x25   : > { %p2276_p6 = scmp.ne.s32.totalorder %s2658_s25, 1 }
  0x26   : > { %v2838_v5 = vld [vmem:[#allocation2] sm:$0xff]  ;;  %v2840_v6 = vld [vmem:[#allocation2 + $0x8] sm:$0xff]  ;;  %2338 = vmatpush3.bf16.msra.mxu0 %v2563_v4 }
  0x27   : > { %v651_v7 = vpack.c.bf16 %v2840_v6, %v2838_v5  ;;  %2343 = vmatprep.subr.bf16.mxu0 %v2668_v3 }
  0x29   : > { %2340 = vmatmul.mubr.msk.bf16.vlgmr.msra.gmra.mxu0 %vm675_vm2, %v651_v7 }
  0x2a   : > { %2345 = vmatprep.mubr.msk.bf16.mxu0 %vm2669_vm1, %v2668_v3 }
  0xe9   : > { %v713_v8 = vpop.f32.mrf.mxu0 }
  0xea   : > { %v714_v11 = vadd.f32 %v2235_v9, %v713_v8 }
  0xeb   : > { %v2341_v10 = vpop.f32.mrf.mxu0 }
  0xec   : > { %v720_v16 = vmul.f32 0.35355338, %v714_v11  ;;  %v770_v19 = vpack.c.bf16 %v714_v11, %v714_v11 }
  0xed   : > { %v716_v12 = vpop.f32.mrf.mxu0 }
  0xee   : > { %v717_v13 = vadd.f32 %v2235_v9, %v716_v12  ;;  %v742_v35 = vpack.c.bf16 %v720_v16, %v720_v16 }
  0xef   : > { %v2342_v14 = vpop.f32.mrf.mxu0 }
  0xf0   : > { %v2527_v15 = vpack.i.bf16 %v717_v13, %v714_v11  ;;  %v721_v17 = vmul.f32 0.35355338, %v717_v13  ;;  %v2858_v20 = vpack.c.bf16 %v717_v13, %v717_v13 }
  0xf2   : > { %2528 = vrot.lane.b32.xlu1 %v2527_v15, %s2670_s26  ;;  %2518 = vrot.lane.b32.xlu0 %v2527_v15, %s2671_s15  ;;  %v2532_v18 = vpack.i.bf16 %v721_v17, %v720_v16  ;;  %v743_v41 = vpack.c.bf16 %v721_v17, %v721_v17 }
  0xf6   : > { %779 = vrot.lane.b32.xlu1 %v770_v19, %s2672_s14  ;;  %2523 = vrot.lane.b32.xlu0 %v2527_v15, %s2673_s18 }
  0xfa   : > { %829 = vrot.lane.b32.xlu0 %v2858_v20, %s2672_s14 }
 0x164   : > { %v2529_v21 = vpop.permute.xlu1 %2528  ;;  %v2519_v22 = vpop.permute.xlu0 %2518 }
 0x165   : > { %v2521_v23 = vunpack.i.h.bf16 %v2519_v22  ;;  %v2520_v24 = vunpack.i.l.bf16 %v2519_v22  ;;  %v2531_v34 = vunpack.i.h.bf16 %v2529_v21  ;;  %v2530_v36 = vunpack.i.l.bf16 %v2529_v21 }
 0x167   : > { %v2862_v25 = vpack.c.bf16 %v2521_v23, %v2521_v23  ;;  %v2864_v26 = vpack.c.bf16 %v2520_v24, %v2520_v24  ;;  %v2882_v39 = vpack.c.bf16 %v2531_v34, %v2531_v34  ;;  %v2887_v40 = vpack.c.bf16 %v2530_v36, %v2530_v36 }
 0x168   : > { %v780_v27 = vpop.permute.xlu1 %779  ;;  %v2524_v28 = vpop.permute.xlu0 %2523 }
 0x169   : > { %v786_v29 = vsel %vm781_vm3, %v780_v27, 0  ;;  %v2525_v30 = vunpack.i.l.bf16 %v2524_v28  ;;  %878 = vrot.lane.b32.xlu1 %v2864_v26, %s2672_s14  ;;  %927 = vrot.lane.b32.xlu0 %v2862_v25, %s2672_s14  ;;  %v2526_v32 = vunpack.i.h.bf16 %v2524_v28 }
 0x16a   : > { %2344 = vmatpush3.bf16.xpose.msra.mxu0 %v786_v29 }
 0x16b   : > { %v2871_v31 = vpack.c.bf16 %v2525_v30, %v2525_v30  ;;  %2349 = vmatprep.subr.bf16.mxu0 %v2668_v3  ;;  %v2876_v37 = vpack.c.bf16 %v2526_v32, %v2526_v32 }
 0x16c   : > { %v830_v33 = vpop.permute.xlu0 %829 }
 0x16d   : > { %976 = vrot.lane.b32.xlu0 %v2871_v31, %s2672_s14  ;;  %2533 = vrot.lane.b32.xlu1 %v2532_v18, %s2671_s15  ;;  %v835_v38 = vsel %vm781_vm3, %v830_v33, 0 }
 0x171   : > { %2346 = vmatmul.mubr.msk.bf16.vlgmr.msra.gmra.mxu0 %vm781_vm3, %v742_v35  ;;  %2538 = vrot.lane.b32.xlu0 %v2532_v18, %s2673_s18  ;;  %s3170_s18 = scalar_lea.vmem %s3146_s6, %s2773_s30 }
 0x172   : > { %1025 = vrot.lane.b32.xlu1 %v2876_v37, %s2672_s14  ;;  %2350 = vmatpush3.bf16.xpose.msra.mxu0 %v835_v38 }
 0x173   : > { %2351 = vmatprep.mubr.msk.bf16.mxu0 %vm2669_vm1, %v2668_v3  ;;  %2361 = vmatprep.subr.bf16.mxu0 %v2668_v3 }
 0x175   : > { %1123 = vrot.lane.b32.xlu0 %v2882_v39, %s2672_s14 }
 0x176   : > { %1074 = vrot.lane.b32.xlu1 %v2887_v40, %s2672_s14 }
 0x179   : > { %2352 = vmatmul.mubr.msk.bf16.vlgmr.msra.gmra.mxu0 %vm781_vm3, %v743_v41 }
 0x17a   : > { %2543 = vrot.lane.b32.xlu1 %v2532_v18, %s2670_s26  ;;  %2363 = vmatprep.mubr.msk.bf16.mxu0 %vm2669_vm1, %v2668_v3  ;;  %s3169_s26 = scalar_lea.vmem %s3145_s5, %s2773_s30 }
 0x17e   : > { %1267 = vrot.lane.b32.xlu1 %v770_v19, %s2674_s21 }
 0x1db   : > { %v879_v42 = vpop.permute.xlu1 %878  ;;  %v928_v43 = vpop.permute.xlu0 %927 }
 0x1dc   : > { %v933_v44 = vsel %vm781_vm3, %v928_v43, 0  ;;  %v884_v45 = vsel %vm781_vm3, %v879_v42, 0 }
 0x1dd   : > { %2356 = vmatpush3.bf16.xpose.msra.mxu1 %v884_v45  ;;  %2362 = vmatpush3.bf16.xpose.msra.mxu0 %v933_v44 }
 0x1de   : > { %2367 = vmatprep.subr.bf16.mxu1 %v2668_v3  ;;  %2373 = vmatprep.subr.bf16.mxu0 %v2668_v3 }
 0x1df   : > { %v977_v46 = vpop.permute.xlu0 %976  ;;  %v2534_v47 = vpop.permute.xlu1 %2533 }
 0x1e0   : > { %v2536_v48 = vunpack.i.h.bf16 %v2534_v47  ;;  %v2535_v49 = vunpack.i.l.bf16 %v2534_v47  ;;  %v982_v53 = vsel %vm781_vm3, %v977_v46, 0 }
 0x1e2   : > { %v745_v50 = vpack.c.bf16 %v2536_v48, %v2536_v48  ;;  %v744_v51 = vpack.c.bf16 %v2535_v49, %v2535_v49 }
 0x1e3   : > { %v2539_v52 = vpop.permute.xlu0 %2538 }
 0x1e4   : > { %v1026_v54 = vpop.permute.xlu1 %1025  ;;  %2358 = vmatmul.mubr.msk.bf16.vlgmr.msra.gmra.mxu1 %vm781_vm3, %v744_v51  ;;  %2364 = vmatmul.mubr.msk.bf16.vlgmr.msra.gmra.mxu0 %vm781_vm3, %v745_v50  ;;  %v2540_v56 = vunpack.i.l.bf16 %v2539_v52  ;;  %v2541_v57 = vunpack.i.h.bf16 %v2539_v52 }
 0x1e5   : > { %v1031_v55 = vsel %vm781_vm3, %v1026_v54, 0  ;;  %2368 = vmatpush3.bf16.xpose.msra.mxu1 %v982_v53  ;;  %2369 = vmatprep.mubr.msk.bf16.mxu1 %vm2669_vm1, %v2668_v3 }
 0x1e6   : > { %2374 = vmatpush3.bf16.xpose.msra.mxu0 %v1031_v55  ;;  %2375 = vmatprep.mubr.msk.bf16.mxu0 %vm2669_vm1, %v2668_v3  ;;  %v746_v59 = vpack.c.bf16 %v2540_v56, %v2540_v56  ;;  %v747_v61 = vpack.c.bf16 %v2541_v57, %v2541_v57 }
 0x1e7   : > { %2379 = vmatprep.subr.bf16.mxu1 %v2668_v3  ;;  %2385 = vmatprep.subr.bf16.mxu0 %v2668_v3  ;;  %v1124_v60 = vpop.permute.xlu0 %1123 }
 0x1e8   : > { %v1075_v58 = vpop.permute.xlu1 %1074  ;;  %v1129_v0 = vsel %vm781_vm3, %v1124_v60, 0 }
 0x1e9   : > { %v1080_v62 = vsel %vm781_vm3, %v1075_v58, 0 }
 0x1ec   : > { %v2544_v63 = vpop.permute.xlu1 %2543  ;;  %2370 = vmatmul.mubr.msk.bf16.vlgmr.msra.gmra.mxu1 %vm781_vm3, %v746_v59 }
 0x1ed   : > { %2376 = vmatmul.mubr.msk.bf16.vlgmr.msra.gmra.mxu0 %vm781_vm3, %v747_v61  ;;  %2380 = vmatpush3.bf16.xpose.msra.mxu1 %v1080_v62  ;;  %v2545_v1 = vunpack.i.l.bf16 %v2544_v63  ;;  %v2546_v2 = vunpack.i.h.bf16 %v2544_v63 }
 0x1ee   : > { %2386 = vmatpush3.bf16.xpose.msra.mxu0 %v1129_v0  ;;  %2381 = vmatprep.mubr.msk.bf16.mxu1 %vm2669_vm1, %v2668_v3 }
 0x1ef   : > { %2387 = vmatprep.mubr.msk.bf16.mxu0 %vm2669_vm1, %v2668_v3  ;;  %2391 = vmatprep.subr.bf16.mxu1 %v2668_v3  ;;  %v748_v7 = vpack.c.bf16 %v2545_v1, %v2545_v1  ;;  %v749_v8 = vpack.c.bf16 %v2546_v2, %v2546_v2 }
 0x1f0   : > { %2397 = vmatprep.subr.bf16.mxu0 %v2668_v3  ;;  %v1268_v4 = vpop.permute.xlu1 %1267 }
 0x1f1   : > { %v1274_v9 = vsel %vm1272_vm4, %v1268_v4, 0 }
 0x1f4   : > { %2382 = vmatmul.mubr.msk.bf16.vlgmr.msra.gmra.mxu1 %vm781_vm3, %v748_v7 }
 0x1f5   : > { %2388 = vmatmul.mubr.msk.bf16.vlgmr.msra.gmra.mxu0 %vm781_vm3, %v749_v8  ;;  %2392 = vmatpush3.bf16.msra.mxu1 %v1274_v9 }
 0x1f6   : > { %2399 = vmatprep.mubr.msk.bf16.mxu0 %vm2669_vm1, %v2668_v3  ;;  %2393 = vmatprep.mubr.msk.bf16.mxu1 %vm2669_vm1, %v2668_v3 }
 0x1f7   : > { %2403 = vmatprep.subr.bf16.mxu1 %v2668_v3 }
 0x231   : > { %v822_v10 = vpop.f32.mrf.mxu0 }
 0x232   : > { %v1171_v11 = vsel %vm781_vm3, %v822_v10, -inf }
 0x233   : > { %1172 = vmax.xlane.f32.xlu0 %v1171_v11  ;;  %v2347_v12 = vpop.f32.mrf.mxu0 }
 0x235   : > { %v825_v13 = vpop.f32.mrf.mxu0 }
 0x237   : > { %v2348_v14 = vpop.f32.mrf.mxu0 }
 0x239   : > { %v871_v15 = vpop.f32.mrf.mxu0 }
 0x23a   : > { %v1174_v16 = vsel %vm781_vm3, %v871_v15, -inf }
 0x23b   : > { %1175 = vmax.xlane.f32.xlu1 %v1174_v16  ;;  %v2353_v17 = vpop.f32.mrf.mxu0 }
 0x23d   : > { %v874_v18 = vpop.f32.mrf.mxu0 }
 0x23f   : > { %v2354_v19 = vpop.f32.mrf.mxu0 }
 0x2a4   : > { %v920_v21 = vpop.f32.mrf.mxu1  ;;  %v969_v22 = vpop.f32.mrf.mxu0 }
 0x2a5   : > { %v1177_v23 = vsel %vm781_vm3, %v920_v21, -inf  ;;  %v1180_v30 = vsel %vm781_vm3, %v969_v22, -inf }
 0x2a6   : > { %v2359_v24 = vpop.f32.mrf.mxu1  ;;  %1178 = vmax.xlane.f32.xlu0 %v1177_v23  ;;  %v2365_v27 = vpop.f32.mrf.mxu0 }
 0x2a8   : > { %v923_v28 = vpop.f32.mrf.mxu1  ;;  %v972_v29 = vpop.f32.mrf.mxu0 }
 0x2aa   : > { %v2360_v32 = vpop.f32.mrf.mxu1  ;;  %1181 = vmax.xlane.f32.xlu0 %v1180_v30  ;;  %v2366_v33 = vpop.f32.mrf.mxu0 }
 0x2ac   : > { %v2934_v34 = vpop.f32.mrf.mxu1 }
 0x2ad   : > { %v2936_v35 = vpop.f32.mrf.mxu0  ;;  %v1183_v36 = vsel %vm781_vm3, %v2934_v34, -inf }
 0x2ae   : > { %v2371_v38 = vpop.f32.mrf.mxu1  ;;  %1184 = vmax.xlane.f32.xlu1 %v1183_v36  ;;  %v1186_v41 = vsel %vm781_vm3, %v2936_v35, -inf }
 0x2af   : > { %1187 = vmax.xlane.f32.xlu0 %v1186_v41  ;;  %v2377_v42 = vpop.f32.mrf.mxu0 }
 0x2b0   : > { %v1021_v43 = vpop.f32.mrf.mxu1 }
 0x2b1   : > { %v1070_v44 = vpop.f32.mrf.mxu0 }
 0x2b2   : > { %v2372_v45 = vpop.f32.mrf.mxu1 }
 0x2b3   : > { %v2378_v46 = vpop.f32.mrf.mxu0 }
 0x2b4   : > { %v1116_v47 = vpop.f32.mrf.mxu1 }
 0x2b5   : > { %v1165_v48 = vpop.f32.mrf.mxu0  ;;  %v1189_v49 = vsel %vm781_vm3, %v1116_v47, -inf }
 0x2b6   : > { %v2383_v50 = vpop.f32.mrf.mxu1  ;;  %1190 = vmax.xlane.f32.xlu1 %v1189_v49  ;;  %v1192_v51 = vsel %vm781_vm3, %v1165_v48, -inf }
 0x2b7   : > { %1193 = vmax.xlane.f32.xlu0 %v1192_v51  ;;  %v2389_v52 = vpop.f32.mrf.mxu0 }
 0x2b8   : > { %v1119_v53 = vpop.f32.mrf.mxu1 }
 0x2b9   : > { %v1168_v54 = vpop.f32.mrf.mxu0 }
 0x2ba   : > { %v2384_v55 = vpop.f32.mrf.mxu1 }
 0x2bb   : > { %v2390_v56 = vpop.f32.mrf.mxu0 }
 0x2bc   : > { %v1173_v58 = vpop.xlane.xlu0 %1172 }
 0x2bd   : > { %v1195_v60 = vsub.f32 %v822_v10, %v1173_v58 }
 0x2bf   : > { %v1203_v62 = vmul.f32 1.442695, %v1195_v60 }
 0x2c4   : > { %v1176_v57 = vpop.xlane.xlu1 %1175 }
 0x2c5   : > { %v1196_v59 = vsub.f32 %v871_v15, %v1176_v57 }
 0x2c7   : > { %1364 = vrot.lane.b32.xlu1 %v2864_v26, %s2674_s21  ;;  %v1205_v61 = vmul.f32 1.442695, %v1196_v59 }
 0x2c9   : > { %2576 = vpow2.f32 %v1205_v61 }
 0x2ca   : > { %2578 = vpow2.f32 %v1203_v62 }
 0x2cb   : > { %1412 = vrot.lane.b32.xlu1 %v2862_v25, %s2674_s21 }
 0x2cd   : > { %1316 = vrot.lane.b32.xlu0 %v2858_v20, %s2674_s21 }
 0x2d6   : > { %v2577_v63 = vpop.eup %2576 }
 0x2d7   : > { %v2950_v0 = vpop.eup %2578  ;;  %v1222_v1 = vsel %vm781_vm3, %v2577_v63, 0.0 }
 0x2d8   : > { %v1219_v25 = vsel %vm781_vm3, %v2950_v0, 0.0 }
 0x2ec   : > { %1223 = vadd.xlane.f32.xlu0 %v1222_v1 }
 0x2ef   : > { %1220 = vadd.xlane.f32.xlu1 %v1219_v25 }
 0x32f   : > { %v1179_v26 = vpop.xlane.xlu0 %1178 }
 0x330   : > { %v1197_v20 = vsub.f32 %v920_v21, %v1179_v26 }
 0x332   : > { %v1207_v2 = vmul.f32 1.442695, %v1197_v20 }
 0x333   : > { %v1182_v4 = vpop.xlane.xlu0 %1181 }
 0x334   : > { %2580 = vpow2.f32 %v1207_v2  ;;  %v1198_v7 = vsub.f32 %v969_v22, %v1182_v4 }
 0x336   : > { %v1209_v8 = vmul.f32 1.442695, %v1198_v7 }
 0x337   : > { %v1185_v17 = vpop.xlane.xlu1 %1184 }
 0x338   : > { %2582 = vpow2.f32 %v1209_v8  ;;  %v1188_v9 = vpop.xlane.xlu0 %1187  ;;  %v1199_v18 = vsub.f32 %v2934_v34, %v1185_v17 }
 0x339   : > { %v1200_v21 = vsub.f32 %v2936_v35, %v1188_v9 }
 0x33a   : > { %v1211_v22 = vmul.f32 1.442695, %v1199_v18 }
 0x33b   : > { %v1213_v24 = vmul.f32 1.442695, %v1200_v21 }
 0x33c   : > { %2584 = vpow2.f32 %v1211_v22 }
 0x33d   : > { %2586 = vpow2.f32 %v1213_v24 }
 0x33f   : > { %v1191_v19 = vpop.xlane.xlu1 %1190 }
 0x340   : > { %v1194_v10 = vpop.xlane.xlu0 %1193  ;;  %v1201_v23 = vsub.f32 %v1116_v47, %v1191_v19 }
 0x341   : > { %v2955_v11 = vpop.eup %2580  ;;  %v1202_v28 = vsub.f32 %v1165_v48, %v1194_v10 }
 0x342   : > { %v1225_v12 = vsel %vm781_vm3, %v2955_v11, 0.0  ;;  %v1215_v27 = vmul.f32 1.442695, %v1201_v23 }
 0x343   : > { %1226 = vadd.xlane.f32.xlu1 %v1225_v12  ;;  %v1217_v29 = vmul.f32 1.442695, %v1202_v28  ;;  %v1365_v30 = vpop.permute.xlu1 %1364 }
 0x344   : > { %v1317_v13 = vpop.permute.xlu0 %1316  ;;  %2588 = vpow2.f32 %v1215_v27  ;;  %v1370_v51 = vsel %vm1272_vm4, %v1365_v30, 0 }
 0x345   : > { %v2959_v14 = vpop.eup %2582  ;;  %v1322_v15 = vsel %vm1272_vm4, %v1317_v13, 0  ;;  %2590 = vpow2.f32 %v1217_v29 }
 0x346   : > { %2398 = vmatpush3.bf16.msra.mxu0 %v1322_v15  ;;  %v1228_v16 = vsel %vm781_vm3, %v2959_v14, 0.0 }
 0x347   : > { %1229 = vadd.xlane.f32.xlu0 %v1228_v16  ;;  %2409 = vmatprep.subr.bf16.mxu0 %v2668_v3  ;;  %v1413_v32 = vpop.permute.xlu1 %1412 }
 0x348   : > { %v1418_v49 = vsel %vm1272_vm4, %v1413_v32, 0 }
 0x354   : > { %1508 = vrot.lane.b32.xlu1 %v2876_v37, %s2674_s21  ;;  %v2971_v37 = vpop.eup %2584 }
 0x355   : > { %v2973_v33 = vpop.eup %2586  ;;  %v1231_v34 = vsel %vm781_vm3, %v2971_v37, 0.0 }
 0x356   : > { %v2977_v35 = vpop.eup %2588  ;;  %v1234_v41 = vsel %vm781_vm3, %v2973_v33, 0.0 }
 0x357   : > { %v1237_v38 = vsel %vm781_vm3, %v2977_v35, 0.0  ;;  %v2983_v42 = vpop.eup %2590 }
 0x358   : > { %v1240_v43 = vsel %vm781_vm3, %v2983_v42, 0.0 }
 0x35d   : > { %1460 = vrot.lane.b32.xlu0 %v2871_v31, %s2674_s21 }
 0x375   : > { %v1224_v31 = vpop.xlane.xlu0 %1223 }
 0x376   : > { %2592 = vrcp.f32 %v1224_v31 }
 0x378   : > { %1232 = vadd.xlane.f32.xlu1 %v1231_v34  ;;  %v1221_v36 = vpop.xlane.xlu1 %1220 }
 0x379   : > { %2594 = vrcp.f32 %v1221_v36 }
 0x37c   : > { %1238 = vadd.xlane.f32.xlu1 %v1237_v38  ;;  %1235 = vadd.xlane.f32.xlu0 %v1234_v41  ;;  %v2564_v38 = vld [vmem:[%s2786_s23 + $0x8] sm:$0xff]  }
 0x380   : > { %1241 = vadd.xlane.f32.xlu0 %v1240_v43 }
 0x383   : > { %v2593_v44 = vpop.eup %2592 }
 0x384   : > { %v1252_v45 = vmul.f32 %v2593_v44, %v2577_v63  ;;  %v2565_v44 = vld [vmem:[%s2786_s23] sm:$0xff]  }
 0x386   : > { %v2595_v46 = vpop.eup %2594  ;;  %v1260_v47 = vpack.c.bf16 %v1252_v45, %v1252_v45 }
 0x387   : > { %v1251_v48 = vmul.f32 %v2595_v46, %v2950_v0 }
 0x388   : > { %2400 = vmatmul.mubr.msk.bf16.vlgmr.msra.gmra.mxu0 %vm781_vm3, %v1260_v47 }
 0x389   : > { %2410 = vmatpush3.bf16.msra.mxu0 %v1418_v49  ;;  %v1259_v50 = vpack.c.bf16 %v1251_v48, %v1251_v48  ;;  %2411 = vmatprep.mubr.msk.bf16.mxu0 %vm2669_vm1, %v2668_v3 }
 0x38a   : > { %2421 = vmatprep.subr.bf16.mxu0 %v2668_v3 }
 0x38b   : > { %2394 = vmatmul.mubr.msk.bf16.vlgmr.msra.gmra.mxu1 %vm781_vm3, %v1259_v50 }
 0x38c   : > { %2404 = vmatpush3.bf16.msra.mxu1 %v1370_v51  ;;  %2405 = vmatprep.mubr.msk.bf16.mxu1 %vm2669_vm1, %v2668_v3 }
 0x38d   : > { %1604 = vrot.lane.b32.xlu1 %v2882_v39, %s2674_s21  ;;  %2415 = vmatprep.subr.bf16.mxu1 %v2668_v3 }
 0x396   : > { %1556 = vrot.lane.b32.xlu0 %v2887_v40, %s2674_s21 }
 0x3cc   : > { %v1227_v52 = vpop.xlane.xlu1 %1226 }
 0x3cd   : > { %2596 = vrcp.f32 %v1227_v52 }
 0x3d0   : > { %v1230_v53 = vpop.xlane.xlu0 %1229  ;;  %v1509_v60 = vpop.permute.xlu1 %1508 }
 0x3d1   : > { %2598 = vrcp.f32 %v1230_v53  ;;  %v1514_v61 = vsel %vm1272_vm4, %v1509_v60, 0 }
 0x3d4   : > { %v1461_v56 = vpop.permute.xlu0 %1460 }
 0x3d5   : > { %v1466_v59 = vsel %vm1272_vm4, %v1461_v56, 0 }
 0x3da   : > { %v2597_v54 = vpop.eup %2596 }
 0x3db   : > { %v1253_v55 = vmul.f32 %v2597_v54, %v2955_v11 }
 0x3dd   : > { %v1261_v57 = vpack.c.bf16 %v1253_v55, %v1253_v55 }
 0x3de   : > { %v2599_v58 = vpop.eup %2598 }
 0x3df   : > { %2406 = vmatmul.mubr.msk.bf16.vlgmr.msra.gmra.mxu1 %vm781_vm3, %v1261_v57  ;;  %v1254_v39 = vmul.f32 %v2599_v58, %v2959_v14 }
 0x3e0   : > { %2416 = vmatpush3.bf16.msra.mxu1 %v1466_v59  ;;  %2417 = vmatprep.mubr.msk.bf16.mxu1 %vm2669_vm1, %v2668_v3 }
 0x3e1   : > { %v1262_v40 = vpack.c.bf16 %v1254_v39, %v1254_v39  ;;  %2427 = vmatprep.subr.bf16.mxu1 %v2668_v3 }
 0x3e3   : > { %2412 = vmatmul.mubr.msk.bf16.vlgmr.msra.gmra.mxu0 %vm781_vm3, %v1262_v40 }
 0x3e4   : > { %2422 = vmatpush3.bf16.msra.mxu0 %v1514_v61  ;;  %2423 = vmatprep.mubr.msk.bf16.mxu0 %vm2669_vm1, %v2668_v3 }
 0x3e5   : > { %2433 = vmatprep.subr.bf16.mxu0 %v2668_v3 }
 0x401   : > { %v1233_v62 = vpop.xlane.xlu1 %1232 }
 0x402   : > { %2600 = vrcp.f32 %v1233_v62 }
 0x405   : > { %v1239_v63 = vpop.xlane.xlu1 %1238  ;;  %v1236_v0 = vpop.xlane.xlu0 %1235 }
 0x406   : > { %2602 = vrcp.f32 %v1239_v63 }
 0x407   : > { %2604 = vrcp.f32 %v1236_v0 }
 0x409   : > { %v1242_v1 = vpop.xlane.xlu0 %1241  ;;  %v1605_v10 = vpop.permute.xlu1 %1604 }
 0x40a   : > { %2606 = vrcp.f32 %v1242_v1  ;;  %v1610_v14 = vsel %vm1272_vm4, %v1605_v10, 0  ;;  %v2255_v10 = vld [vmem:[%s3168_s16] ss:$0 sm:$0xff] }
 0x40d   : > { %v1557_v20 = vpop.permute.xlu0 %1556 }
 0x40e   : > { %v1562_v8 = vsel %vm1272_vm4, %v1557_v20, 0 }
 0x40f   : > { %v2601_v25 = vpop.eup %2600 }
 0x410   : > { %v1255_v26 = vmul.f32 %v2601_v25, %v2971_v37 }
 0x412   : > { %v1263_v2 = vpack.c.bf16 %v1255_v26, %v1255_v26 }
 0x413   : > { %v2603_v4 = vpop.eup %2602 }
 0x414   : > { %v2605_v7 = vpop.eup %2604  ;;  %2418 = vmatmul.mubr.msk.bf16.vlgmr.msra.gmra.mxu1 %vm781_vm3, %v1263_v2  ;;  %v1257_v11 = vmul.f32 %v2603_v4, %v2977_v35 }
 0x415   : > { %2428 = vmatpush3.bf16.msra.mxu1 %v1562_v8  ;;  %v1256_v9 = vmul.f32 %v2605_v7, %v2973_v33  ;;  %2429 = vmatprep.mubr.msk.bf16.mxu1 %vm2669_vm1, %v2668_v3 }
 0x416   : > { %2439 = vmatprep.subr.bf16.mxu1 %v2668_v3  ;;  %v1265_v15 = vpack.c.bf16 %v1257_v11, %v1257_v11 }
 0x417   : > { %v1264_v12 = vpack.c.bf16 %v1256_v9, %v1256_v9  ;;  %v2607_v13 = vpop.eup %2606 }
 0x418   : > { %v1258_v16 = vmul.f32 %v2607_v13, %v2983_v42 }
 0x419   : > { %2424 = vmatmul.mubr.msk.bf16.vlgmr.msra.gmra.mxu0 %vm781_vm3, %v1264_v12 }
 0x41a   : > { %2434 = vmatpush3.bf16.msra.mxu0 %v1610_v14  ;;  %2435 = vmatprep.mubr.msk.bf16.mxu0 %vm2669_vm1, %v2668_v3  ;;  %v1266_v17 = vpack.c.bf16 %v1258_v16, %v1258_v16 }
 0x41b   : > { %2447 = vmatprep.subr.bf16.mxu0 %v2668_v3 }
 0x41c   : > { %2430 = vmatmul.mubr.msk.bf16.vlgmr.msra.gmra.mxu1 %vm781_vm3, %v1265_v15 }
 0x41d   : > { %2443 = vmatprep.mubr.msk.bf16.mxu1 %vm2669_vm1, %v2668_v3  ;;  %2440 = vmatpush3.bf16.msra.mxu1 %v2564_v38  ;;  %v2572_v38 = vld [vmem:[%s2813_s29 + $0x18] sm:$0xff]  }
 0x41e   : > { %2441 = vmatprep.subr.bf16.mxu1 %v2668_v3 }
 0x421   : > { %2436 = vmatmul.mubr.msk.bf16.vlgmr.msra.gmra.mxu0 %vm781_vm3, %v1266_v17  ;;  %2442 = vmatpush3.bf16.msra.mxu1 %v2565_v44 }
 0x422   : > { %2451 = vmatprep.mubr.msk.bf16.mxu0 %vm2669_vm1, %v2668_v3  ;;  %2455 = vmatprep.subr.bf16.mxu1 %v2668_v3 }
 0x448   : > { %v1358_v18 = vpop.f32.mrf.mxu0 }
 0x44a   : > { %v2401_v19 = vpop.f32.mrf.mxu0 }
 0x44b   : > { %v1310_v21 = vpop.f32.mrf.mxu1 }
 0x44c   : > { %v1361_v22 = vpop.f32.mrf.mxu0 }
 0x44d   : > { %v2395_v23 = vpop.f32.mrf.mxu1 }
 0x44e   : > { %v2402_v24 = vpop.f32.mrf.mxu0 }
 0x44f   : > { %v1313_v27 = vpop.f32.mrf.mxu1 }
 0x451   : > { %v2396_v28 = vpop.f32.mrf.mxu1 }
 0x49f   : > { %v1406_v29 = vpop.f32.mrf.mxu1 }
 0x4a1   : > { %v2407_v30 = vpop.f32.mrf.mxu1 }
 0x4a3   : > { %v1409_v37 = vpop.f32.mrf.mxu1  ;;  %v1454_v32 = vpop.f32.mrf.mxu0 }
 0x4a4   : > { %v2547_v31 = vpack.i.bf16 %v1454_v32, %v1406_v29  ;;  %v2566_v32 = vld [vmem:[%s2803_s19 + $0x8] sm:$0xff]  }
 0x4a5   : > { %v2408_v33 = vpop.f32.mrf.mxu1  ;;  %v2413_v34 = vpop.f32.mrf.mxu0  ;;  %2448 = vmatpush3.bf16.msra.mxu0 %v2566_v32 }
 0x4a6   : > { %2548 = vrot.lane.b32.xlu0 %v2547_v31, %s2675_s22  ;;  %v2567_v31 = vld [vmem:[%s2803_s19] sm:$0xff]   ;;  %2449 = vmatprep.subr.bf16.mxu0 %v2668_v3  ;;  %v2568_v33 = vld [vmem:[%s2813_s29 + $0x38] sm:$0xff]   ;;  %v2569_v34 = vld [vmem:[%s2813_s29 + $0x30] sm:$0xff]  }
 0x4a7   : > { %v1457_v35 = vpop.f32.mrf.mxu0 }
 0x4a8   : > { %v2570_v35 = vld [vmem:[%s2813_s29 + $0x28] sm:$0xff]  }
 0x4a9   : > { %v2414_v36 = vpop.f32.mrf.mxu0  ;;  %2450 = vmatpush3.bf16.msra.mxu0 %v2567_v31  ;;  %v2274_v31 = vld [vmem:[%s634_s17] ss:$0 sm:$0xff] }
 0x4aa   : > { %v2571_v36 = vld [vmem:[%s2813_s29 + $0x20] sm:$0xff]  }
 0x4d4   : > { %v1502_v41 = vpop.f32.mrf.mxu1 }
 0x4d6   : > { %v2419_v42 = vpop.f32.mrf.mxu1 }
 0x4d8   : > { %v1505_v43 = vpop.f32.mrf.mxu1 }
 0x4d9   : > { %v1550_v45 = vpop.f32.mrf.mxu0 }
 0x4da   : > { %v2552_v46 = vpack.i.bf16 %v1550_v45, %v1502_v41  ;;  %v2420_v47 = vpop.f32.mrf.mxu1 }
 0x4db   : > { %v2425_v48 = vpop.f32.mrf.mxu0 }
 0x4dc   : > { %2553 = vrot.lane.b32.xlu1 %v2552_v46, %s2676_s3  ;;  %v1598_v49 = vpop.f32.mrf.mxu1 }
 0x4dd   : > { %v1553_v50 = vpop.f32.mrf.mxu0 }
 0x4de   : > { %v2431_v51 = vpop.f32.mrf.mxu1 }
 0x4df   : > { %v2426_v52 = vpop.f32.mrf.mxu0 }
 0x4e0   : > { %v1601_v53 = vpop.f32.mrf.mxu1 }
 0x4e1   : > { %v1646_v54 = vpop.f32.mrf.mxu0  ;;  %v2260_v53 = vld [vmem:[%s3170_s18] ss:$0 sm:$0xff] }
 0x4e2   : > { %v2557_v55 = vpack.i.bf16 %v1646_v54, %v1598_v49  ;;  %v2432_v56 = vpop.f32.mrf.mxu1  ;;  %v2259_v49 = vld [vmem:[%s3169_s26] ss:$0 sm:$0xff] }
 0x4e3   : > { %v2437_v57 = vpop.f32.mrf.mxu0 }
 0x4e4   : > { %2558 = vrot.lane.b32.xlu0 %v2557_v55, %s2677_s24 }
 0x4e5   : > { %v1649_v58 = vpop.f32.mrf.mxu0 }
 0x4e6   : > { %v2573_v58 = vld [vmem:[%s2813_s29 + $0x10] sm:$0xff]  }
 0x4e7   : > { %v2438_v59 = vpop.f32.mrf.mxu0 }
 0x4e8   : > { %v2574_v59 = vld [vmem:[%s2813_s29 + $0x8] sm:$0xff]  }
 0x518   : > { %v2549_v39 = vpop.permute.xlu0 %2548 }
 0x519   : > { %v2551_v40 = vunpack.i.h.bf16 %v2549_v39  ;;  %v2550_v61 = vunpack.i.l.bf16 %v2549_v39  ;;  %v2575_v39 = vld [vmem:[%s2813_s29] sm:$0xff]  }
 0x51b   : > { %v1677_v1 = vsel %vm781_vm3, %v1358_v18, %v2551_v40  ;;  %v1676_v25 = vsel %vm781_vm3, %v1310_v21, %v2550_v61 }
 0x54e   : > { %v2554_v60 = vpop.permute.xlu1 %2553 }
 0x54f   : > { %v2556_v62 = vunpack.i.h.bf16 %v2554_v60  ;;  %v2555_v63 = vunpack.i.l.bf16 %v2554_v60  ;;  %v2261_v60 = vld [vmem:[%s623_s1] ss:$0 sm:$0xff] }
 0x551   : > { %v1680_v2 = vsel %vm1678_vm5, %v1677_v1, %v2556_v62  ;;  %v1679_v4 = vsel %vm1678_vm5, %v1676_v25, %v2555_v63 }
 0x556   : > { %v2559_v0 = vpop.permute.xlu0 %2558 }
 0x557   : > { %v2561_v26 = vunpack.i.h.bf16 %v2559_v0  ;;  %v2560_v20 = vunpack.i.l.bf16 %v2559_v0 }
 0x559   : > { %v1683_v7 = vsel %vm1681_vm6, %v1680_v2, %v2561_v26  ;;  %v1682_v8 = vsel %vm1681_vm6, %v1679_v4, %v2560_v20 }
 0x55a   : > { %v1684_v9 = vpack.c.bf16 %v1683_v7, %v1682_v8 }
 0x55c   : > { %2444 = vmatmul.mubr.msk.bf16.vlgmr.msra.gmra.mxu1 %vm675_vm2, %v1684_v9 }
 0x55d   : > { %2471 = vmatprep.mubr.msk.bf16.mxu1 %vm2669_vm1, %v2668_v3  ;;  %2456 = vmatpush3.bf16.msra.mxu1 %v2568_v33 }
 0x55e   : > { %2457 = vmatprep.subr.bf16.mxu1 %v2668_v3 }
 0x561   : > { %2458 = vmatpush3.bf16.msra.mxu1 %v2569_v34  ;;  %v2275_v34 = vld [vmem:[%s637_s27] ss:$0 sm:$0xff] }
 0x562   : > { %2459 = vmatprep.subr.bf16.mxu1 %v2668_v3 }
 0x565   : > { %2460 = vmatpush3.bf16.msra.mxu1 %v2570_v35 }
 0x566   : > { %2461 = vmatprep.subr.bf16.mxu1 %v2668_v3 }
 0x569   : > { %2462 = vmatpush3.bf16.msra.mxu1 %v2571_v36 }
 0x56a   : > { %2463 = vmatprep.subr.bf16.mxu1 %v2668_v3 }
 0x56d   : > { %2464 = vmatpush3.bf16.msra.mxu1 %v2572_v38 }
 0x56e   : > { %2465 = vmatprep.subr.bf16.mxu1 %v2668_v3 }
 0x571   : > { %2466 = vmatpush3.bf16.msra.mxu1 %v2573_v58 }
 0x572   : > { %2467 = vmatprep.subr.bf16.mxu1 %v2668_v3 }
 0x575   : > { %2468 = vmatpush3.bf16.msra.mxu1 %v2574_v59 }
 0x576   : > { %2469 = vmatprep.subr.bf16.mxu1 %v2668_v3  ;;  %v2265_v3 = vld [vmem:[%s631_s0] ss:$0 sm:$0xff] }
 0x579   : > { %2470 = vmatpush3.bf16.msra.mxu1 %v2575_v39 }
 0x61c   : > { %v1745_v11 = vpop.f32.mrf.mxu1 }
 0x61d   : > { %v1746_v12 = vadd.f32 %v2255_v10, %v1745_v11 }
 0x61e   : > { %v2445_v13 = vpop.f32.mrf.mxu1 }
 0x61f   : > { %v1752_v14 = vadd.f32 %v1746_v12, %v2838_v5 }
 0x620   : > { %v1748_v15 = vpop.f32.mrf.mxu1 }
 0x621   : > { %v1749_v16 = vadd.f32 %v2255_v10, %v1748_v15  ;;  %v1756_v17 = vsel %vm675_vm2, %v1752_v14, 0.0 }
 0x622   : > { %1757 = vadd.xlane.f32.xlu1 %v1756_v17  ;;  %v2446_v18 = vpop.f32.mrf.mxu1 }
 0x623   : > { %v1753_v19 = vadd.f32 %v1749_v16, %v2840_v6 }
 0x625   : > { %v1759_v21 = vsel %vm675_vm2, %v1753_v19, 0.0 }
 0x626   : > { %1760 = vadd.xlane.f32.xlu0 %v1759_v21 }
 0x6ab   : > { %v1758_v22 = vpop.xlane.xlu1 %1757 }
 0x6ac   : > { %v1763_v23 = vmul.f32 0.03125, %v1758_v22 }
 0x6ae   : > { %v1765_v24 = vsub.f32 %v1752_v14, %v1763_v23 }
 0x6af   : > { %v1761_v27 = vpop.xlane.xlu0 %1760 }
 0x6b0   : > { %v1764_v5 = vmul.f32 0.03125, %v1761_v27  ;;  %v1767_v28 = vmul.f32 %v1765_v24, %v1765_v24 }
 0x6b2   : > { %v1766_v29 = vsub.f32 %v1753_v19, %v1764_v5  ;;  %v1769_v30 = vsel %vm675_vm2, %v1767_v28, 0.0 }
 0x6b3   : > { %1770 = vadd.xlane.f32.xlu0 %v1769_v30 }
 0x6b4   : > { %v1768_v37 = vmul.f32 %v1766_v29, %v1766_v29 }
 0x6b6   : > { %v1772_v6 = vsel %vm675_vm2, %v1768_v37, 0.0 }
 0x6b7   : > { %1773 = vadd.xlane.f32.xlu1 %v1772_v6 }
 0x73c   : > { %v1771_v41 = vpop.xlane.xlu0 %1770 }
 0x73d   : > { %v1775_v42 = vmul.f32 0.03125, %v1771_v41 }
 0x73f   : > { %v1777_v43 = vadd.f32 1e-05, %v1775_v42 }
 0x740   : > { %v1774_v44 = vpop.xlane.xlu1 %1773 }
 0x741   : > { %2608 = vrsqrt.f32 %v1777_v43  ;;  %v1776_v45 = vmul.f32 0.03125, %v1774_v44 }
 0x743   : > { %v1778_v46 = vadd.f32 1e-05, %v1776_v45 }
 0x745   : > { %2610 = vrsqrt.f32 %v1778_v46 }
 0x74e   : > { %v2609_v47 = vpop.eup %2608 }
 0x74f   : > { %v1781_v48 = vmul.f32 %v2609_v47, %v1765_v24 }
 0x751   : > { %v1789_v52 = vmul.f32 %v2259_v49, %v1781_v48 }
 0x752   : > { %v2611_v50 = vpop.eup %2610 }
 0x753   : > { %v1782_v51 = vmul.f32 %v2611_v50, %v1766_v29  ;;  %v1797_v55 = vadd.f32 %v2260_v53, %v1789_v52 }
 0x755   : > { %v1790_v54 = vmul.f32 %v2259_v49, %v1782_v51 }
 0x757   : > { %v1798_v56 = vadd.f32 %v2260_v53, %v1790_v54 }
 0x759   : > { %v1799_v57 = vpack.c.bf16 %v1798_v56, %v1797_v55 }
 0x75b   : > { %2452 = vmatmul.mubr.msk.bf16.vlgmr.msra.gmra.mxu0 %vm675_vm2, %v1799_v57 }
 0x81b   : > { %v1860_v40 = vpop.f32.mrf.mxu0 }
 0x81c   : > { %v1861_v62 = vadd.f32 %v2261_v60, %v1860_v40 }
 0x81d   : > { %v2453_v61 = vpop.f32.mrf.mxu0 }
 0x81e   : > { %v1867_v25 = vmax.f32 %v1861_v62, 0.0 }
 0x81f   : > { %v1863_v63 = vpop.f32.mrf.mxu0 }
 0x820   : > { %v1864_v0 = vadd.f32 %v2261_v60, %v1863_v63 }
 0x821   : > { %v2454_v1 = vpop.f32.mrf.mxu0 }
 0x822   : > { %v1868_v26 = vmax.f32 %v1864_v0, 0.0 }
 0x824   : > { %v1869_v20 = vpack.c.bf16 %v1868_v26, %v1867_v25 }
 0x826   : > { %2472 = vmatmul.mubr.bf16.vlgmr.msra.gmra.mxu1 %v1869_v20 }
 0x8e6   : > { %v1975_v2 = vpop.f32.mrf.mxu1 }
 0x8e7   : > { %v1976_v4 = vadd.f32 %v2265_v3, %v1975_v2 }
 0x8e8   : > { %v2473_v7 = vpop.f32.mrf.mxu1 }
 0x8e9   : > { %v1982_v8 = vadd.f32 %v1976_v4, %v1797_v55 }
 0x8ea   : > { %v1978_v9 = vpop.f32.mrf.mxu1 }
 0x8eb   : > { %v1979_v10 = vadd.f32 %v2265_v3, %v1978_v9  ;;  %v1986_v11 = vsel %vm675_vm2, %v1982_v8, 0.0 }
 0x8ec   : > { %1987 = vadd.xlane.f32.xlu0 %v1986_v11  ;;  %v2474_v12 = vpop.f32.mrf.mxu1 }
 0x8ed   : > { %v1983_v13 = vadd.f32 %v1979_v10, %v1798_v56 }
 0x8ef   : > { %v1989_v14 = vsel %vm675_vm2, %v1983_v13, 0.0 }
 0x8f0   : > { %1990 = vadd.xlane.f32.xlu1 %v1989_v14 }
 0x975   : > { %v1988_v15 = vpop.xlane.xlu0 %1987 }
 0x976   : > { %v1992_v16 = vmul.f32 0.03125, %v1988_v15 }
 0x978   : > { %v1994_v17 = vsub.f32 %v1982_v8, %v1992_v16 }
 0x979   : > { %v1991_v18 = vpop.xlane.xlu1 %1990 }
 0x97a   : > { %v1993_v19 = vmul.f32 0.03125, %v1991_v18  ;;  %v1996_v21 = vmul.f32 %v1994_v17, %v1994_v17 }
 0x97c   : > { %v1995_v22 = vsub.f32 %v1983_v13, %v1993_v19  ;;  %v1998_v23 = vsel %vm675_vm2, %v1996_v21, 0.0 }
 0x97d   : > { %1999 = vadd.xlane.f32.xlu0 %v1998_v23 }
 0x97e   : > { %v1997_v24 = vmul.f32 %v1995_v22, %v1995_v22 }
 0x980   : > { %v2001_v27 = vsel %vm675_vm2, %v1997_v24, 0.0 }
 0x981   : > { %2002 = vadd.xlane.f32.xlu1 %v2001_v27 }
 0xa06   : > { %v2000_v5 = vpop.xlane.xlu0 %1999 }
 0xa07   : > { %v2004_v28 = vmul.f32 0.03125, %v2000_v5 }
 0xa09   : > { %v2006_v29 = vadd.f32 1e-05, %v2004_v28 }
 0xa0a   : > { %v2003_v30 = vpop.xlane.xlu1 %2002 }
 0xa0b   : > { %2612 = vrsqrt.f32 %v2006_v29  ;;  %v2005_v37 = vmul.f32 0.03125, %v2003_v30 }
 0xa0d   : > { %v2007_v6 = vadd.f32 1e-05, %v2005_v37 }
 0xa0f   : > { %2614 = vrsqrt.f32 %v2007_v6 }
 0xa18   : > { %v2613_v32 = vpop.eup %2612 }
 0xa19   : > { %v2010_v33 = vmul.f32 %v2613_v32, %v1994_v17 }
 0xa1b   : > { %v2018_v35 = vmul.f32 %v2274_v31, %v2010_v33 }
 0xa1c   : > { %v2615_v36 = vpop.eup %2614 }
 0xa1d   : > { %v2026_v38 = vadd.f32 %v2275_v34, %v2018_v35  ;;  %v2011_v41 = vmul.f32 %v2615_v36, %v1995_v22 }
 0xa1f   : > { %2028 = vst.msk [vmem:[#allocation2] sm:$0xff] %vm675_vm2, %v2026_v38  ;;  %v2019_v42 = vmul.f32 %v2274_v31, %v2011_v41  ;;  %2033 = sbr.rel (%p2276_p6) target bundleno = 2597 (0xa25), region = 80 }
 0xa21   : > { %v2027_v43 = vadd.f32 %v2275_v34, %v2019_v42 }
 0xa23   : > { %2029 = vst.msk [vmem:[#allocation2 + $0x8] sm:$0xff] %vm675_vm2, %v2027_v43 }
 0xa24   : > { %2034 = vst.msk [vmem:[#allocation3] sm:$0xff] %vm675_vm2, %v2026_v38  ;;  %2035 = vst.msk [vmem:[#allocation3 + $0x8] sm:$0xff] %vm675_vm2, %v2027_v43 }
 0xa25 PF: > { %s3171_s30 = sld [smem:[#allocation7_spill]]  ;;  %s2678_s16 = smov [#allocation3]  }
 0xa26   : > { %s2045_s19 = sshll.u32 %s2678_s16, 4  ;;  %s2046_s19 = int_to_ptr.vmem [resolvable:$true] %s2045_s19 }
 0xa27   : > { %s2616_s13 = scalar_lea.vmem %s2046_s19, 256  ;;  %p2623_p11 = scmp.lt.s32.totalorder %s2046_s19, %s2046_s19 }
 0xa28   : > { %p2617_p8 = scmp.ne.s32.totalorder %s2046_s19, %s2616_s13  ;;  %p2624_p12 = scmp.lt.s32.totalorder %s2616_s13, %s2616_s13 }
 0xa2a   : > { %p2625_p13 = por %p2624_p12, %p2623_p11 }
 0xa2b   : > { %s3172_s27 = sadd.s32 4294967295, %s3171_s30  }
 0xa2c   : > { %p3115_p7 = scmp.eq.s32.totalorder %s3172_s27, 1 }
 0xa2e   : > { %p2618_p9 = pnand %p2617_p8, %p3115_p7 }
 0xa30   : > { %p2619_p10 = pneg %p2618_p9 }
 0xa32   : > { %p2626_p0 = pnand %p2625_p13, %p2619_p10 }
 0xa34   : > { %2629 = shalt.err (!%p2626_p0)
}
 0xa35   : > { %s2679_s25 = smov 128   ;;  %s3174_s14 = sld [smem:[#allocation12_spill]] }
 0xa3b   : > { %2476 = dma.vmem_to_hbm [thread:$0]  (%p3115_p7), %s2046_s19, 256, %s3174_s14, [#allocation4], %s2679_s25, %s2679_s25, %s2675_s22  }
 0xa3c   : > { %2653 = dma.done.wait (%p3115_p7), [#allocation4], 256  }
 0xa3d   : > { %2655 = vsyncadd (%p3115_p7), [#allocation4], 4294967040 }
 0xa3e PF: > { %s3175_s18 = sld [smem:[#allocation7_spill]] }
 0xa3f   : > { %s3176_s25 = sld [smem:[#allocation6_spill]] }
 0xa40   : > { %s3177_s26 = sld [smem:[#allocation8_spill]] }
 0xa44   : > { %s24_s27 = sadd.s32 1, %s3175_s18  }
 0xa45   : > { %p21_p1 = scmp.ge.s32.totalorder %s24_s27, 4  }
 0xa47   :  { %23 = sbr.rel (!%p21_p1) target bundleno = 7 (0x7), region = 144 }
 0xa4c   :  { %2061 = vsyncpa [#allocation4], 1 }
 0xa4d   :  { %2063 = vsyncpa [#allocation4 + $0x1], 1 }

</bundles_post_ra>
